<compile_context>
chip_gen: v6e
topology: v6e:2x2x1
jax: 0.10.0
libtpu: 0.0.40
codegen_flags: <defaults>
</compile_context>

<pallas_src>
import functools

import jax
import jax.numpy as jnp
from jax.experimental import pallas as pl
from jax.experimental.pallas import tpu as pltpu

LANE = 128
VMEM_LIMIT = 32 * 1024 * 1024  # stay well under the 64 MiB v7x physical VMEM


def _round_up(x, m):
    return ((x + m - 1) // m) * m


def _choose_tm(m):
    """Row tile: big tiles for big M (amortize grid-step overhead, grid >= 2
    for megacore), tiny multiple-of-16 tiles for tiny M (no 16x zero pad)."""
    if m >= 2048:
        return 512
    if m >= 512:
        return 256
    if m >= 128:
        return 128
    return max(16, _round_up(m, 16))


# ------------------------------ Pallas kernels ------------------------------ #
def _enc_dec_kernel(a_ref, we_ref, be_ref, wd_ref, bd_ref, fe_ref, fd_ref):
    """Fused encoder conv-GEMM (+bias+ReLU) and decoder 1x1 projection
    (+bias+ReLU) on the same row tile.  Lane dims are padded to 128."""
    acc = jnp.dot(a_ref[...], we_ref[...], preferred_element_type=jnp.float32)
    h = jnp.maximum(acc + be_ref[...], 0.0)               # (TM, 128) f32
    fe_ref[...] = h.astype(fe_ref.dtype)                  # encoder feature
    acc2 = jnp.dot(h.astype(jnp.bfloat16), wd_ref[...],
                   preferred_element_type=jnp.float32)
    fd_ref[...] = jnp.maximum(acc2 + bd_ref[...], 0.0).astype(fd_ref.dtype)


def _sum_head_kernel(d0_ref, d1_ref, d2_ref, d3_ref, w_ref, b_ref, o_ref):
    """Fused decoder-sum + 1x1 classification head (Cout padded to 128)."""
    s = d0_ref[...] + d1_ref[...] + d2_ref[...] + d3_ref[...]   # (TM, 16) bf16
    acc = jnp.dot(s, w_ref[...], preferred_element_type=jnp.float32)
    o_ref[...] = (acc + b_ref[...]).astype(o_ref.dtype)


# ------------------------------ GEMM wrappers ------------------------------- #
def fused_conv_proj(patches, we, be, wd, bd, cout_e, cout_d):
    """One encoder stage: (patches @ We + be).relu  and its decoder projection
    (h @ Wd + bd).relu, in a single pallas_call."""
    M, K = patches.shape
    Kp, Cpe = we.shape
    _, Cpd = wd.shape
    tm = _choose_tm(M)
    Mp = _round_up(M, tm)

    a = patches.astype(jnp.bfloat16)
    if Mp != M or Kp != K:
        a = jnp.pad(a, ((0, Mp - M), (0, Kp - K)))

    cost = pl.CostEstimate(
        flops=2 * Mp * Kp * Cpe + 2 * Mp * Cpe * Cpd,
        transcendentals=0,
        bytes_accessed=Mp * Kp * 2 + Kp * Cpe * 2 + Cpe * Cpd * 2
        + (Cpe + Cpd) * 4 + Mp * Cpe * 2 + Mp * Cpd * 4,
    )
    fe, fd = pl.pallas_call(
        _enc_dec_kernel,
        out_shape=(jax.ShapeDtypeStruct((Mp, Cpe), jnp.bfloat16),
                   jax.ShapeDtypeStruct((Mp, Cpd), jnp.float32)),
        grid=(Mp // tm,),
        in_specs=[
            pl.BlockSpec((tm, Kp), lambda i: (i, 0)),
            pl.BlockSpec((Kp, Cpe), lambda i: (0, 0)),
            pl.BlockSpec((1, Cpe), lambda i: (0, 0)),
            pl.BlockSpec((Cpe, Cpd), lambda i: (0, 0)),
            pl.BlockSpec((1, Cpd), lambda i: (0, 0)),
        ],
        out_specs=(pl.BlockSpec((tm, Cpe), lambda i: (i, 0)),
                   pl.BlockSpec((tm, Cpd), lambda i: (i, 0))),
        compiler_params=pltpu.CompilerParams(
            dimension_semantics=("parallel",),
            vmem_limit_bytes=VMEM_LIMIT),
        cost_estimate=cost,
    )(a, we, be, wd, bd)
    return fe[:M, :cout_e], fd[:M, :cout_d]


def fused_sum_head(ds, wp, bp, cout, *, out_dtype=jnp.float32):
    """Sum four (M, C) decoder tensors and apply the 1x1 head in one kernel."""
    M, C = ds[0].shape
    Kp, Cp = wp.shape
    assert Kp == C
    tm = _choose_tm(M)
    Mp = _round_up(M, tm)

    ds_p = []
    for d in ds:
        d = d.astype(jnp.bfloat16)
        if Mp != M:
            d = jnp.pad(d, ((0, Mp - M), (0, 0)))
        ds_p.append(d)

    cost = pl.CostEstimate(
        flops=2 * Mp * Kp * Cp + 3 * Mp * Kp,
        transcendentals=0,
        bytes_accessed=4 * Mp * Kp * 2 + Kp * Cp * 2 + Cp * 4
        + Mp * Cp * jnp.dtype(out_dtype).itemsize,
    )
    out = pl.pallas_call(
        _sum_head_kernel,
        out_shape=jax.ShapeDtypeStruct((Mp, Cp), out_dtype),
        grid=(Mp // tm,),
        in_specs=[pl.BlockSpec((tm, C), lambda i: (i, 0)) for _ in range(4)]
        + [pl.BlockSpec((Kp, Cp), lambda i: (0, 0)),
           pl.BlockSpec((1, Cp), lambda i: (0, 0))],
        out_specs=pl.BlockSpec((tm, Cp), lambda i: (i, 0)),
        compiler_params=pltpu.CompilerParams(
            dimension_semantics=("parallel",),
            vmem_limit_bytes=VMEM_LIMIT),
        cost_estimate=cost,
    )(*ds_p, wp, bp)
    return out[:M, :cout]


# -------------------------------- im2col ------------------------------------ #
def _im2col(x, kh, kw, stride, padding):
    """NHWC -> (N*Ho*Wo, kh*kw*C) patch matrix (plus output spatial dims)."""
    N, H, W, C = x.shape
    Ho = (H + 2 * padding - kh) // stride + 1
    Wo = (W + 2 * padding - kw) // stride + 1
    if kh == 1 and kw == 1 and stride == 1 and padding == 0:
        return x.reshape(N * Ho * Wo, C), Ho, Wo
    # TODO(synk): im2col patches are materialized in HBM (9x traffic
    # amplification for 3x3); an in-kernel windowed gather would remove this
    # at large resolutions.
    xp = jnp.pad(x, ((0, 0), (padding, padding), (padding, padding), (0, 0)))
    cols = []
    for i in range(kh):
        for j in range(kw):
            cols.append(xp[:, i:i + stride * (Ho - 1) + 1:stride,
                           j:j + stride * (Wo - 1) + 1:stride, :])
    patches = jnp.concatenate(cols, axis=-1).reshape(N * Ho * Wo, kh * kw * C)
    return patches, Ho, Wo


# ------------------------------- parameters --------------------------------- #
def init_params():
    key = jax.random.PRNGKey(0)
    ks = jax.random.split(key, 16)
    scale = 0.1

    def conv_w(k, cout, cin, kh, kw):
        return scale * jax.random.normal(k, (cout, cin, kh, kw), jnp.float32)

    p = {}
    enc_ch = [(8, 3), (16, 8), (32, 16), (64, 32)]
    for idx, (co, ci) in enumerate(enc_ch):
        p[f"enc{idx}_w"] = conv_w(ks[idx], co, ci, 3, 3)
        p[f"enc{idx}_b"] = jnp.zeros((co,), jnp.float32)
    dec_ci = [8, 16, 32, 64]
    for idx, ci in enumerate(dec_ci):
        p[f"dec{idx}_w"] = conv_w(ks[4 + idx], 16, ci, 1, 1)
        p[f"dec{idx}_b"] = jnp.zeros((16,), jnp.float32)
    p["head_w"] = conv_w(ks[8], 2, 16, 1, 1)
    p["head_b"] = jnp.zeros((2,), jnp.float32)
    return p


def _pack_conv(w_oihw, b, *, k_pad_to=16):
    """(Cout,Cin,kh,kw) -> lane-dense GEMM weight (Kp, Cp) bf16, bias (1,Cp) f32."""
    cout, cin, kh, kw = w_oihw.shape
    K = kh * kw * cin
    Kp = _round_up(K, k_pad_to)
    Cp = _round_up(cout, LANE)          # lane-dense output -> unmasked vst
    w_mat = jnp.transpose(w_oihw, (2, 3, 1, 0)).reshape(K, cout)
    wp = jnp.zeros((Kp, Cp), jnp.bfloat16).at[:K, :cout].set(
        w_mat.astype(jnp.bfloat16))
    bp = jnp.zeros((1, Cp), jnp.float32).at[0, :cout].set(b.astype(jnp.float32))
    return wp, bp, cout, (kh, kw, cin)


def pack_params(p):
    packed = {}
    for idx in range(4):
        packed[f"enc{idx}"] = _pack_conv(p[f"enc{idx}_w"], p[f"enc{idx}_b"])
        # decoder 1x1 weights consume the 128-lane-padded encoder feature, so
        # pad their K dim to 128 (extra rows are zero; padded input lanes are
        # zero after bias+ReLU anyway).
        packed[f"dec{idx}"] = _pack_conv(p[f"dec{idx}_w"], p[f"dec{idx}_b"],
                                         k_pad_to=LANE)
    packed["head"] = _pack_conv(p["head_w"], p["head_b"])
    return packed


# ------------------------------- forward pass -------------------------------- #
def fire_segmentation_forward(packed, x_nchw):
    """x_nchw: (N, 3, H, W) float32 -> (N, 2, H, W) segmentation logits."""
    N, C, H, W = x_nchw.shape
    x = jnp.transpose(x_nchw, (0, 2, 3, 1)).astype(jnp.bfloat16)  # -> NHWC

    h = x
    ups = []
    for idx in range(4):
        we, be, ce, (kh, kw, _) = packed[f"enc{idx}"]
        wd, bd, cd, _ = packed[f"dec{idx}"]
        patches, Ho, Wo = _im2col(h, kh, kw, stride=2, padding=1)
        # Fused per-stage kernel: encoder conv+ReLU and decoder 1x1 projection.
        fe, fd = fused_conv_proj(patches, we, be, wd, bd, ce, cd)
        h = fe.reshape(N, Ho, Wo, ce)                       # next-stage input
        d = fd.reshape(N, Ho, Wo, cd)                       # this-scale decode
        # TODO(synk): multi-scale bilinear upsample kept in XLA (half-pixel
        # semantics); no clean single-BlockSpec Pallas form.
        d = jax.image.resize(d, (N, H, W, cd), method="bilinear")
        ups.append(d.astype(jnp.bfloat16).reshape(N * H * W, cd))

    # Fused: sum of the four upsampled projections + 1x1 head, one kernel.
    wh, bh, ch, _ = packed["head"]
    out = fused_sum_head(ups, wh, bh, ch, out_dtype=jnp.float32)
    out = out.reshape(N, H, W, ch)
    return jnp.transpose(out, (0, 3, 1, 2))  # -> NCHW (N, 2, H, W)


# ----------------------------------- main ------------------------------------ #
if __name__ == "__main__":
    params = init_params()
    packed = pack_params(params)

    key = jax.random.PRNGKey(0)
    x = jax.random.normal(key, (2, 3, 32, 32), jnp.float32)  # NCHW image batch

    fwd = jax.jit(functools.partial(fire_segmentation_forward, packed))
    out = fwd(x)
    jax.block_until_ready(out)

    assert out.shape == (2, 2, 32, 32), out.shape
    assert out.dtype == jnp.float32
    assert bool(jnp.all(jnp.isfinite(out)))
    print("KERNEL_OK")
</pallas_src>

<mosaic_0001>
module attributes {stable_mosaic.version = 11 : i64} {
  func.func @_enc_dec_kernel(%arg0: i32, %arg1: memref<256x32xbf16, #tpu.memory_space<vmem>>, %arg2: memref<32x128xbf16, #tpu.memory_space<vmem>>, %arg3: memref<1x128xf32, #tpu.memory_space<vmem>>, %arg4: memref<128x128xbf16, #tpu.memory_space<vmem>>, %arg5: memref<1x128xf32, #tpu.memory_space<vmem>>, %arg6: memref<256x128xbf16, #tpu.memory_space<vmem>>, %arg7: memref<256x128xf32, #tpu.memory_space<vmem>>) attributes {dimension_semantics = [#tpu.dimension_semantics<parallel>], iteration_bounds = array<i64: 2>, scalar_prefetch = 0 : i64, scratch_operands = 0 : i64, tpu.core_type = #tpu.core_type<tc>, window_params = [{transform_indices = @transform_0, window_bounds = array<i64: 256, 32>}, {pipeline_mode = #tpu.pipeline_mode<synchronous>, transform_indices = @transform_1, window_bounds = array<i64: 32, 128>}, {pipeline_mode = #tpu.pipeline_mode<synchronous>, transform_indices = @transform_2, window_bounds = array<i64: 1, 128>}, {pipeline_mode = #tpu.pipeline_mode<synchronous>, transform_indices = @transform_3, window_bounds = array<i64: 128, 128>}, {pipeline_mode = #tpu.pipeline_mode<synchronous>, transform_indices = @transform_4, window_bounds = array<i64: 1, 128>}, {transform_indices = @transform_5, window_bounds = array<i64: 256, 128>}, {transform_indices = @transform_6, window_bounds = array<i64: 256, 128>}]} {
    %c0 = arith.constant 0 : index
    %c0_0 = arith.constant 0 : index
    %0 = vector.load %arg1[%c0, %c0_0] : memref<256x32xbf16, #tpu.memory_space<vmem>>, vector<256x32xbf16>
    %c0_1 = arith.constant 0 : index
    %c0_2 = arith.constant 0 : index
    %1 = vector.load %arg2[%c0_1, %c0_2] : memref<32x128xbf16, #tpu.memory_space<vmem>>, vector<32x128xbf16>
    %cst = arith.constant dense<0.000000e+00> : vector<256x128xf32>
    %2 = tpu.matmul %0, %1, %cst {dimension_numbers = #tpu.dot_dimension_numbers<[1], [0], [0], [1], [0, 0, 1, 1], [], []>} : vector<256x32xbf16>, vector<32x128xbf16>, vector<256x128xf32> -> vector<256x128xf32>
    %c0_3 = arith.constant 0 : index
    %c0_4 = arith.constant 0 : index
    %3 = vector.load %arg3[%c0_3, %c0_4] : memref<1x128xf32, #tpu.memory_space<vmem>>, vector<1x128xf32>
    %4 = vector.broadcast %3 : vector<1x128xf32> to vector<256x128xf32>
    %5 = arith.addf %2, %4 : vector<256x128xf32>
    %cst_5 = arith.constant 0.000000e+00 : f32
    %6 = vector.broadcast %cst_5 : f32 to vector<256x128xf32>
    %7 = arith.maximumf %5, %6 : vector<256x128xf32>
    %8 = arith.truncf %7 : vector<256x128xf32> to vector<256x128xbf16>
    %c0_6 = arith.constant 0 : index
    %c0_7 = arith.constant 0 : index
    %9 = vector.load %arg6[%c0_6, %c0_7] : memref<256x128xbf16, #tpu.memory_space<vmem>>, vector<256x128xbf16>
    tpu.vector_store %arg6[%c0_6, %c0_7], %8 {strides = array<i32>} : memref<256x128xbf16, #tpu.memory_space<vmem>>, vector<256x128xbf16>,
    %10 = arith.truncf %7 : vector<256x128xf32> to vector<256x128xbf16>
    %c0_8 = arith.constant 0 : index
    %c0_9 = arith.constant 0 : index
    %11 = vector.load %arg4[%c0_8, %c0_9] : memref<128x128xbf16, #tpu.memory_space<vmem>>, vector<128x128xbf16>
    %cst_10 = arith.constant dense<0.000000e+00> : vector<256x128xf32>
    %12 = tpu.matmul %10, %11, %cst_10 {dimension_numbers = #tpu.dot_dimension_numbers<[1], [0], [0], [1], [0, 0, 1, 1], [], []>} : vector<256x128xbf16>, vector<128x128xbf16>, vector<256x128xf32> -> vector<256x128xf32>
    %c0_11 = arith.constant 0 : index
    %c0_12 = arith.constant 0 : index
    %13 = vector.load %arg5[%c0_11, %c0_12] : memref<1x128xf32, #tpu.memory_space<vmem>>, vector<1x128xf32>
    %14 = vector.broadcast %13 : vector<1x128xf32> to vector<256x128xf32>
    %15 = arith.addf %12, %14 : vector<256x128xf32>
    %cst_13 = arith.constant 0.000000e+00 : f32
    %16 = vector.broadcast %cst_13 : f32 to vector<256x128xf32>
    %17 = arith.maximumf %15, %16 : vector<256x128xf32>
    %c0_14 = arith.constant 0 : index
    %c0_15 = arith.constant 0 : index
    %18 = vector.load %arg7[%c0_14, %c0_15] : memref<256x128xf32, #tpu.memory_space<vmem>>, vector<256x128xf32>
    tpu.vector_store %arg7[%c0_14, %c0_15], %17 {strides = array<i32>} : memref<256x128xf32, #tpu.memory_space<vmem>>, vector<256x128xf32>,
    return
  }
  func.func @transform_0(%arg0: i32) -> (i32, i32) {
    %c0_i32 = arith.constant 0 : i32
    %c0_i32_0 = arith.constant 0 : i32
    return %arg0, %c0_i32 : i32, i32
  }
  func.func @transform_1(%arg0: i32) -> (i32, i32) {
    %c0_i32 = arith.constant 0 : i32
    %c0_i32_0 = arith.constant 0 : i32
    %c0_i32_1 = arith.constant 0 : i32
    return %c0_i32, %c0_i32_0 : i32, i32
  }
  func.func @transform_2(%arg0: i32) -> (i32, i32) {
    %c0_i32 = arith.constant 0 : i32
    %c0_i32_0 = arith.constant 0 : i32
    %c0_i32_1 = arith.constant 0 : i32
    return %c0_i32, %c0_i32_0 : i32, i32
  }
  func.func @transform_3(%arg0: i32) -> (i32, i32) {
    %c0_i32 = arith.constant 0 : i32
    %c0_i32_0 = arith.constant 0 : i32
    %c0_i32_1 = arith.constant 0 : i32
    return %c0_i32, %c0_i32_0 : i32, i32
  }
  func.func @transform_4(%arg0: i32) -> (i32, i32) {
    %c0_i32 = arith.constant 0 : i32
    %c0_i32_0 = arith.constant 0 : i32
    %c0_i32_1 = arith.constant 0 : i32
    return %c0_i32, %c0_i32_0 : i32, i32
  }
  func.func @transform_5(%arg0: i32) -> (i32, i32) {
    %c0_i32 = arith.constant 0 : i32
    %c0_i32_0 = arith.constant 0 : i32
    return %arg0, %c0_i32 : i32, i32
  }
  func.func @transform_6(%arg0: i32) -> (i32, i32) {
    %c0_i32 = arith.constant 0 : i32
    %c0_i32_0 = arith.constant 0 : i32
    return %arg0, %c0_i32 : i32, i32
  }
}

module attributes {stable_mosaic.version = 11 : i64} {
  func.func @_enc_dec_kernel(%arg0: i32, %arg1: memref<128x80xbf16, #tpu.memory_space<vmem>>, %arg2: memref<80x128xbf16, #tpu.memory_space<vmem>>, %arg3: memref<1x128xf32, #tpu.memory_space<vmem>>, %arg4: memref<128x128xbf16, #tpu.memory_space<vmem>>, %arg5: memref<1x128xf32, #tpu.memory_space<vmem>>, %arg6: memref<128x128xbf16, #tpu.memory_space<vmem>>, %arg7: memref<128x128xf32, #tpu.memory_space<vmem>>) attributes {dimension_semantics = [#tpu.dimension_semantics<parallel>], iteration_bounds = array<i64: 1>, scalar_prefetch = 0 : i64, scratch_operands = 0 : i64, tpu.core_type = #tpu.core_type<tc>, window_params = [{transform_indices = @transform_0, window_bounds = array<i64: 128, 80>}, {pipeline_mode = #tpu.pipeline_mode<synchronous>, transform_indices = @transform_1, window_bounds = array<i64: 80, 128>}, {pipeline_mode = #tpu.pipeline_mode<synchronous>, transform_indices = @transform_2, window_bounds = array<i64: 1, 128>}, {pipeline_mode = #tpu.pipeline_mode<synchronous>, transform_indices = @transform_3, window_bounds = array<i64: 128, 128>}, {pipeline_mode = #tpu.pipeline_mode<synchronous>, transform_indices = @transform_4, window_bounds = array<i64: 1, 128>}, {transform_indices = @transform_5, window_bounds = array<i64: 128, 128>}, {transform_indices = @transform_6, window_bounds = array<i64: 128, 128>}]} {
    %c0 = arith.constant 0 : index
    %c0_0 = arith.constant 0 : index
    %0 = vector.load %arg1[%c0, %c0_0] : memref<128x80xbf16, #tpu.memory_space<vmem>>, vector<128x80xbf16>
    %c0_1 = arith.constant 0 : index
    %c0_2 = arith.constant 0 : index
    %1 = vector.load %arg2[%c0_1, %c0_2] : memref<80x128xbf16, #tpu.memory_space<vmem>>, vector<80x128xbf16>
    %cst = arith.constant dense<0.000000e+00> : vector<128x128xf32>
    %2 = tpu.matmul %0, %1, %cst {dimension_numbers = #tpu.dot_dimension_numbers<[1], [0], [0], [1], [0, 0, 1, 1], [], []>} : vector<128x80xbf16>, vector<80x128xbf16>, vector<128x128xf32> -> vector<128x128xf32>
    %c0_3 = arith.constant 0 : index
    %c0_4 = arith.constant 0 : index
    %3 = vector.load %arg3[%c0_3, %c0_4] : memref<1x128xf32, #tpu.memory_space<vmem>>, vector<1x128xf32>
    %4 = vector.broadcast %3 : vector<1x128xf32> to vector<128x128xf32>
    %5 = arith.addf %2, %4 : vector<128x128xf32>
    %cst_5 = arith.constant 0.000000e+00 : f32
    %6 = vector.broadcast %cst_5 : f32 to vector<128x128xf32>
    %7 = arith.maximumf %5, %6 : vector<128x128xf32>
    %8 = arith.truncf %7 : vector<128x128xf32> to vector<128x128xbf16>
    %c0_6 = arith.constant 0 : index
    %c0_7 = arith.constant 0 : index
    %9 = vector.load %arg6[%c0_6, %c0_7] : memref<128x128xbf16, #tpu.memory_space<vmem>>, vector<128x128xbf16>
    tpu.vector_store %arg6[%c0_6, %c0_7], %8 {strides = array<i32>} : memref<128x128xbf16, #tpu.memory_space<vmem>>, vector<128x128xbf16>,
    %10 = arith.truncf %7 : vector<128x128xf32> to vector<128x128xbf16>
    %c0_8 = arith.constant 0 : index
    %c0_9 = arith.constant 0 : index
    %11 = vector.load %arg4[%c0_8, %c0_9] : memref<128x128xbf16, #tpu.memory_space<vmem>>, vector<128x128xbf16>
    %cst_10 = arith.constant dense<0.000000e+00> : vector<128x128xf32>
    %12 = tpu.matmul %10, %11, %cst_10 {dimension_numbers = #tpu.dot_dimension_numbers<[1], [0], [0], [1], [0, 0, 1, 1], [], []>} : vector<128x128xbf16>, vector<128x128xbf16>, vector<128x128xf32> -> vector<128x128xf32>
    %c0_11 = arith.constant 0 : index
    %c0_12 = arith.constant 0 : index
    %13 = vector.load %arg5[%c0_11, %c0_12] : memref<1x128xf32, #tpu.memory_space<vmem>>, vector<1x128xf32>
    %14 = vector.broadcast %13 : vector<1x128xf32> to vector<128x128xf32>
    %15 = arith.addf %12, %14 : vector<128x128xf32>
    %cst_13 = arith.constant 0.000000e+00 : f32
    %16 = vector.broadcast %cst_13 : f32 to vector<128x128xf32>
    %17 = arith.maximumf %15, %16 : vector<128x128xf32>
    %c0_14 = arith.constant 0 : index
    %c0_15 = arith.constant 0 : index
    %18 = vector.load %arg7[%c0_14, %c0_15] : memref<128x128xf32, #tpu.memory_space<vmem>>, vector<128x128xf32>
    tpu.vector_store %arg7[%c0_14, %c0_15], %17 {strides = array<i32>} : memref<128x128xf32, #tpu.memory_space<vmem>>, vector<128x128xf32>,
    return
  }
  func.func @transform_0(%arg0: i32) -> (i32, i32) {
    %c0_i32 = arith.constant 0 : i32
    %c0_i32_0 = arith.constant 0 : i32
    return %arg0, %c0_i32 : i32, i32
  }
  func.func @transform_1(%arg0: i32) -> (i32, i32) {
    %c0_i32 = arith.constant 0 : i32
    %c0_i32_0 = arith.constant 0 : i32
    %c0_i32_1 = arith.constant 0 : i32
    return %c0_i32, %c0_i32_0 : i32, i32
  }
  func.func @transform_2(%arg0: i32) -> (i32, i32) {
    %c0_i32 = arith.constant 0 : i32
    %c0_i32_0 = arith.constant 0 : i32
    %c0_i32_1 = arith.constant 0 : i32
    return %c0_i32, %c0_i32_0 : i32, i32
  }
  func.func @transform_3(%arg0: i32) -> (i32, i32) {
    %c0_i32 = arith.constant 0 : i32
    %c0_i32_0 = arith.constant 0 : i32
    %c0_i32_1 = arith.constant 0 : i32
    return %c0_i32, %c0_i32_0 : i32, i32
  }
  func.func @transform_4(%arg0: i32) -> (i32, i32) {
    %c0_i32 = arith.constant 0 : i32
    %c0_i32_0 = arith.constant 0 : i32
    %c0_i32_1 = arith.constant 0 : i32
    return %c0_i32, %c0_i32_0 : i32, i32
  }
  func.func @transform_5(%arg0: i32) -> (i32, i32) {
    %c0_i32 = arith.constant 0 : i32
    %c0_i32_0 = arith.constant 0 : i32
    return %arg0, %c0_i32 : i32, i32
  }
  func.func @transform_6(%arg0: i32) -> (i32, i32) {
    %c0_i32 = arith.constant 0 : i32
    %c0_i32_0 = arith.constant 0 : i32
    return %arg0, %c0_i32 : i32, i32
  }
}

module attributes {stable_mosaic.version = 11 : i64} {
  func.func @_enc_dec_kernel(%arg0: i32, %arg1: memref<32x144xbf16, #tpu.memory_space<vmem>>, %arg2: memref<144x128xbf16, #tpu.memory_space<vmem>>, %arg3: memref<1x128xf32, #tpu.memory_space<vmem>>, %arg4: memref<128x128xbf16, #tpu.memory_space<vmem>>, %arg5: memref<1x128xf32, #tpu.memory_space<vmem>>, %arg6: memref<32x128xbf16, #tpu.memory_space<vmem>>, %arg7: memref<32x128xf32, #tpu.memory_space<vmem>>) attributes {dimension_semantics = [#tpu.dimension_semantics<parallel>], iteration_bounds = array<i64: 1>, scalar_prefetch = 0 : i64, scratch_operands = 0 : i64, tpu.core_type = #tpu.core_type<tc>, window_params = [{transform_indices = @transform_0, window_bounds = array<i64: 32, 144>}, {pipeline_mode = #tpu.pipeline_mode<synchronous>, transform_indices = @transform_1, window_bounds = array<i64: 144, 128>}, {pipeline_mode = #tpu.pipeline_mode<synchronous>, transform_indices = @transform_2, window_bounds = array<i64: 1, 128>}, {pipeline_mode = #tpu.pipeline_mode<synchronous>, transform_indices = @transform_3, window_bounds = array<i64: 128, 128>}, {pipeline_mode = #tpu.pipeline_mode<synchronous>, transform_indices = @transform_4, window_bounds = array<i64: 1, 128>}, {transform_indices = @transform_5, window_bounds = array<i64: 32, 128>}, {transform_indices = @transform_6, window_bounds = array<i64: 32, 128>}]} {
    %c0 = arith.constant 0 : index
    %c0_0 = arith.constant 0 : index
    %0 = vector.load %arg1[%c0, %c0_0] : memref<32x144xbf16, #tpu.memory_space<vmem>>, vector<32x144xbf16>
    %c0_1 = arith.constant 0 : index
    %c0_2 = arith.constant 0 : index
    %1 = vector.load %arg2[%c0_1, %c0_2] : memref<144x128xbf16, #tpu.memory_space<vmem>>, vector<144x128xbf16>
    %cst = arith.constant dense<0.000000e+00> : vector<32x128xf32>
    %2 = tpu.matmul %0, %1, %cst {dimension_numbers = #tpu.dot_dimension_numbers<[1], [0], [0], [1], [0, 0, 1, 1], [], []>} : vector<32x144xbf16>, vector<144x128xbf16>, vector<32x128xf32> -> vector<32x128xf32>
    %c0_3 = arith.constant 0 : index
    %c0_4 = arith.constant 0 : index
    %3 = vector.load %arg3[%c0_3, %c0_4] : memref<1x128xf32, #tpu.memory_space<vmem>>, vector<1x128xf32>
    %4 = vector.broadcast %3 : vector<1x128xf32> to vector<32x128xf32>
    %5 = arith.addf %2, %4 : vector<32x128xf32>
    %cst_5 = arith.constant 0.000000e+00 : f32
    %6 = vector.broadcast %cst_5 : f32 to vector<32x128xf32>
    %7 = arith.maximumf %5, %6 : vector<32x128xf32>
    %8 = arith.truncf %7 : vector<32x128xf32> to vector<32x128xbf16>
    %c0_6 = arith.constant 0 : index
    %c0_7 = arith.constant 0 : index
    %9 = vector.load %arg6[%c0_6, %c0_7] : memref<32x128xbf16, #tpu.memory_space<vmem>>, vector<32x128xbf16>
    tpu.vector_store %arg6[%c0_6, %c0_7], %8 {strides = array<i32>} : memref<32x128xbf16, #tpu.memory_space<vmem>>, vector<32x128xbf16>,
    %10 = arith.truncf %7 : vector<32x128xf32> to vector<32x128xbf16>
    %c0_8 = arith.constant 0 : index
    %c0_9 = arith.constant 0 : index
    %11 = vector.load %arg4[%c0_8, %c0_9] : memref<128x128xbf16, #tpu.memory_space<vmem>>, vector<128x128xbf16>
    %cst_10 = arith.constant dense<0.000000e+00> : vector<32x128xf32>
    %12 = tpu.matmul %10, %11, %cst_10 {dimension_numbers = #tpu.dot_dimension_numbers<[1], [0], [0], [1], [0, 0, 1, 1], [], []>} : vector<32x128xbf16>, vector<128x128xbf16>, vector<32x128xf32> -> vector<32x128xf32>
    %c0_11 = arith.constant 0 : index
    %c0_12 = arith.constant 0 : index
    %13 = vector.load %arg5[%c0_11, %c0_12] : memref<1x128xf32, #tpu.memory_space<vmem>>, vector<1x128xf32>
    %14 = vector.broadcast %13 : vector<1x128xf32> to vector<32x128xf32>
    %15 = arith.addf %12, %14 : vector<32x128xf32>
    %cst_13 = arith.constant 0.000000e+00 : f32
    %16 = vector.broadcast %cst_13 : f32 to vector<32x128xf32>
    %17 = arith.maximumf %15, %16 : vector<32x128xf32>
    %c0_14 = arith.constant 0 : index
    %c0_15 = arith.constant 0 : index
    %18 = vector.load %arg7[%c0_14, %c0_15] : memref<32x128xf32, #tpu.memory_space<vmem>>, vector<32x128xf32>
    tpu.vector_store %arg7[%c0_14, %c0_15], %17 {strides = array<i32>} : memref<32x128xf32, #tpu.memory_space<vmem>>, vector<32x128xf32>,
    return
  }
  func.func @transform_0(%arg0: i32) -> (i32, i32) {
    %c0_i32 = arith.constant 0 : i32
    %c0_i32_0 = arith.constant 0 : i32
    return %arg0, %c0_i32 : i32, i32
  }
  func.func @transform_1(%arg0: i32) -> (i32, i32) {
    %c0_i32 = arith.constant 0 : i32
    %c0_i32_0 = arith.constant 0 : i32
    %c0_i32_1 = arith.constant 0 : i32
    return %c0_i32, %c0_i32_0 : i32, i32
  }
  func.func @transform_2(%arg0: i32) -> (i32, i32) {
    %c0_i32 = arith.constant 0 : i32
    %c0_i32_0 = arith.constant 0 : i32
    %c0_i32_1 = arith.constant 0 : i32
    return %c0_i32, %c0_i32_0 : i32, i32
  }
  func.func @transform_3(%arg0: i32) -> (i32, i32) {
    %c0_i32 = arith.constant 0 : i32
    %c0_i32_0 = arith.constant 0 : i32
    %c0_i32_1 = arith.constant 0 : i32
    return %c0_i32, %c0_i32_0 : i32, i32
  }
  func.func @transform_4(%arg0: i32) -> (i32, i32) {
    %c0_i32 = arith.constant 0 : i32
    %c0_i32_0 = arith.constant 0 : i32
    %c0_i32_1 = arith.constant 0 : i32
    return %c0_i32, %c0_i32_0 : i32, i32
  }
  func.func @transform_5(%arg0: i32) -> (i32, i32) {
    %c0_i32 = arith.constant 0 : i32
    %c0_i32_0 = arith.constant 0 : i32
    return %arg0, %c0_i32 : i32, i32
  }
  func.func @transform_6(%arg0: i32) -> (i32, i32) {
    %c0_i32 = arith.constant 0 : i32
    %c0_i32_0 = arith.constant 0 : i32
    return %arg0, %c0_i32 : i32, i32
  }
}

module attributes {stable_mosaic.version = 11 : i64} {
  func.func @_enc_dec_kernel(%arg0: i32, %arg1: memref<16x288xbf16, #tpu.memory_space<vmem>>, %arg2: memref<288x128xbf16, #tpu.memory_space<vmem>>, %arg3: memref<1x128xf32, #tpu.memory_space<vmem>>, %arg4: memref<128x128xbf16, #tpu.memory_space<vmem>>, %arg5: memref<1x128xf32, #tpu.memory_space<vmem>>, %arg6: memref<16x128xbf16, #tpu.memory_space<vmem>>, %arg7: memref<16x128xf32, #tpu.memory_space<vmem>>) attributes {dimension_semantics = [#tpu.dimension_semantics<parallel>], iteration_bounds = array<i64: 1>, scalar_prefetch = 0 : i64, scratch_operands = 0 : i64, tpu.core_type = #tpu.core_type<tc>, window_params = [{transform_indices = @transform_0, window_bounds = array<i64: 16, 288>}, {pipeline_mode = #tpu.pipeline_mode<synchronous>, transform_indices = @transform_1, window_bounds = array<i64: 288, 128>}, {pipeline_mode = #tpu.pipeline_mode<synchronous>, transform_indices = @transform_2, window_bounds = array<i64: 1, 128>}, {pipeline_mode = #tpu.pipeline_mode<synchronous>, transform_indices = @transform_3, window_bounds = array<i64: 128, 128>}, {pipeline_mode = #tpu.pipeline_mode<synchronous>, transform_indices = @transform_4, window_bounds = array<i64: 1, 128>}, {transform_indices = @transform_5, window_bounds = array<i64: 16, 128>}, {transform_indices = @transform_6, window_bounds = array<i64: 16, 128>}]} {
    %c0 = arith.constant 0 : index
    %c0_0 = arith.constant 0 : index
    %0 = vector.load %arg1[%c0, %c0_0] : memref<16x288xbf16, #tpu.memory_space<vmem>>, vector<16x288xbf16>
    %c0_1 = arith.constant 0 : index
    %c0_2 = arith.constant 0 : index
    %1 = vector.load %arg2[%c0_1, %c0_2] : memref<288x128xbf16, #tpu.memory_space<vmem>>, vector<288x128xbf16>
    %cst = arith.constant dense<0.000000e+00> : vector<16x128xf32>
    %2 = tpu.matmul %0, %1, %cst {dimension_numbers = #tpu.dot_dimension_numbers<[1], [0], [0], [1], [0, 0, 1, 1], [], []>} : vector<16x288xbf16>, vector<288x128xbf16>, vector<16x128xf32> -> vector<16x128xf32>
    %c0_3 = arith.constant 0 : index
    %c0_4 = arith.constant 0 : index
    %3 = vector.load %arg3[%c0_3, %c0_4] : memref<1x128xf32, #tpu.memory_space<vmem>>, vector<1x128xf32>
    %4 = vector.broadcast %3 : vector<1x128xf32> to vector<16x128xf32>
    %5 = arith.addf %2, %4 : vector<16x128xf32>
    %cst_5 = arith.constant 0.000000e+00 : f32
    %6 = vector.broadcast %cst_5 : f32 to vector<16x128xf32>
    %7 = arith.maximumf %5, %6 : vector<16x128xf32>
    %8 = arith.truncf %7 : vector<16x128xf32> to vector<16x128xbf16>
    %c0_6 = arith.constant 0 : index
    %c0_7 = arith.constant 0 : index
    %9 = vector.load %arg6[%c0_6, %c0_7] : memref<16x128xbf16, #tpu.memory_space<vmem>>, vector<16x128xbf16>
    tpu.vector_store %arg6[%c0_6, %c0_7], %8 {strides = array<i32>} : memref<16x128xbf16, #tpu.memory_space<vmem>>, vector<16x128xbf16>,
    %10 = arith.truncf %7 : vector<16x128xf32> to vector<16x128xbf16>
    %c0_8 = arith.constant 0 : index
    %c0_9 = arith.constant 0 : index
    %11 = vector.load %arg4[%c0_8, %c0_9] : memref<128x128xbf16, #tpu.memory_space<vmem>>, vector<128x128xbf16>
    %cst_10 = arith.constant dense<0.000000e+00> : vector<16x128xf32>
    %12 = tpu.matmul %10, %11, %cst_10 {dimension_numbers = #tpu.dot_dimension_numbers<[1], [0], [0], [1], [0, 0, 1, 1], [], []>} : vector<16x128xbf16>, vector<128x128xbf16>, vector<16x128xf32> -> vector<16x128xf32>
    %c0_11 = arith.constant 0 : index
    %c0_12 = arith.constant 0 : index
    %13 = vector.load %arg5[%c0_11, %c0_12] : memref<1x128xf32, #tpu.memory_space<vmem>>, vector<1x128xf32>
    %14 = vector.broadcast %13 : vector<1x128xf32> to vector<16x128xf32>
    %15 = arith.addf %12, %14 : vector<16x128xf32>
    %cst_13 = arith.constant 0.000000e+00 : f32
    %16 = vector.broadcast %cst_13 : f32 to vector<16x128xf32>
    %17 = arith.maximumf %15, %16 : vector<16x128xf32>
    %c0_14 = arith.constant 0 : index
    %c0_15 = arith.constant 0 : index
    %18 = vector.load %arg7[%c0_14, %c0_15] : memref<16x128xf32, #tpu.memory_space<vmem>>, vector<16x128xf32>
    tpu.vector_store %arg7[%c0_14, %c0_15], %17 {strides = array<i32>} : memref<16x128xf32, #tpu.memory_space<vmem>>, vector<16x128xf32>,
    return
  }
  func.func @transform_0(%arg0: i32) -> (i32, i32) {
    %c0_i32 = arith.constant 0 : i32
    %c0_i32_0 = arith.constant 0 : i32
    return %arg0, %c0_i32 : i32, i32
  }
  func.func @transform_1(%arg0: i32) -> (i32, i32) {
    %c0_i32 = arith.constant 0 : i32
    %c0_i32_0 = arith.constant 0 : i32
    %c0_i32_1 = arith.constant 0 : i32
    return %c0_i32, %c0_i32_0 : i32, i32
  }
  func.func @transform_2(%arg0: i32) -> (i32, i32) {
    %c0_i32 = arith.constant 0 : i32
    %c0_i32_0 = arith.constant 0 : i32
    %c0_i32_1 = arith.constant 0 : i32
    return %c0_i32, %c0_i32_0 : i32, i32
  }
  func.func @transform_3(%arg0: i32) -> (i32, i32) {
    %c0_i32 = arith.constant 0 : i32
    %c0_i32_0 = arith.constant 0 : i32
    %c0_i32_1 = arith.constant 0 : i32
    return %c0_i32, %c0_i32_0 : i32, i32
  }
  func.func @transform_4(%arg0: i32) -> (i32, i32) {
    %c0_i32 = arith.constant 0 : i32
    %c0_i32_0 = arith.constant 0 : i32
    %c0_i32_1 = arith.constant 0 : i32
    return %c0_i32, %c0_i32_0 : i32, i32
  }
  func.func @transform_5(%arg0: i32) -> (i32, i32) {
    %c0_i32 = arith.constant 0 : i32
    %c0_i32_0 = arith.constant 0 : i32
    return %arg0, %c0_i32 : i32, i32
  }
  func.func @transform_6(%arg0: i32) -> (i32, i32) {
    %c0_i32 = arith.constant 0 : i32
    %c0_i32_0 = arith.constant 0 : i32
    return %arg0, %c0_i32 : i32, i32
  }
}

module attributes {stable_mosaic.version = 11 : i64} {
  func.func @_sum_head_kernel(%arg0: i32, %arg1: memref<512x16xbf16, #tpu.memory_space<vmem>>, %arg2: memref<512x16xbf16, #tpu.memory_space<vmem>>, %arg3: memref<512x16xbf16, #tpu.memory_space<vmem>>, %arg4: memref<512x16xbf16, #tpu.memory_space<vmem>>, %arg5: memref<16x128xbf16, #tpu.memory_space<vmem>>, %arg6: memref<1x128xf32, #tpu.memory_space<vmem>>, %arg7: memref<512x128xf32, #tpu.memory_space<vmem>>) attributes {dimension_semantics = [#tpu.dimension_semantics<parallel>], iteration_bounds = array<i64: 4>, scalar_prefetch = 0 : i64, scratch_operands = 0 : i64, tpu.core_type = #tpu.core_type<tc>, window_params = [{transform_indices = @transform_0, window_bounds = array<i64: 512, 16>}, {transform_indices = @transform_1, window_bounds = array<i64: 512, 16>}, {transform_indices = @transform_2, window_bounds = array<i64: 512, 16>}, {transform_indices = @transform_3, window_bounds = array<i64: 512, 16>}, {pipeline_mode = #tpu.pipeline_mode<synchronous>, transform_indices = @transform_4, window_bounds = array<i64: 16, 128>}, {pipeline_mode = #tpu.pipeline_mode<synchronous>, transform_indices = @transform_5, window_bounds = array<i64: 1, 128>}, {transform_indices = @transform_6, window_bounds = array<i64: 512, 128>}]} {
    %c0 = arith.constant 0 : index
    %c0_0 = arith.constant 0 : index
    %0 = vector.load %arg1[%c0, %c0_0] : memref<512x16xbf16, #tpu.memory_space<vmem>>, vector<512x16xbf16>
    %c0_1 = arith.constant 0 : index
    %c0_2 = arith.constant 0 : index
    %1 = vector.load %arg2[%c0_1, %c0_2] : memref<512x16xbf16, #tpu.memory_space<vmem>>, vector<512x16xbf16>
    %2 = arith.addf %0, %1 : vector<512x16xbf16>
    %c0_3 = arith.constant 0 : index
    %c0_4 = arith.constant 0 : index
    %3 = vector.load %arg3[%c0_3, %c0_4] : memref<512x16xbf16, #tpu.memory_space<vmem>>, vector<512x16xbf16>
    %4 = arith.addf %2, %3 : vector<512x16xbf16>
    %c0_5 = arith.constant 0 : index
    %c0_6 = arith.constant 0 : index
    %5 = vector.load %arg4[%c0_5, %c0_6] : memref<512x16xbf16, #tpu.memory_space<vmem>>, vector<512x16xbf16>
    %6 = arith.addf %4, %5 : vector<512x16xbf16>
    %c0_7 = arith.constant 0 : index
    %c0_8 = arith.constant 0 : index
    %7 = vector.load %arg5[%c0_7, %c0_8] : memref<16x128xbf16, #tpu.memory_space<vmem>>, vector<16x128xbf16>
    %cst = arith.constant dense<0.000000e+00> : vector<512x128xf32>
    %8 = tpu.matmul %6, %7, %cst {dimension_numbers = #tpu.dot_dimension_numbers<[1], [0], [0], [1], [0, 0, 1, 1], [], []>} : vector<512x16xbf16>, vector<16x128xbf16>, vector<512x128xf32> -> vector<512x128xf32>
    %c0_9 = arith.constant 0 : index
    %c0_10 = arith.constant 0 : index
    %9 = vector.load %arg6[%c0_9, %c0_10] : memref<1x128xf32, #tpu.memory_space<vmem>>, vector<1x128xf32>
    %10 = vector.broadcast %9 : vector<1x128xf32> to vector<512x128xf32>
    %11 = arith.addf %8, %10 : vector<512x128xf32>
    %c0_11 = arith.constant 0 : index
    %c0_12 = arith.constant 0 : index
    %12 = vector.load %arg7[%c0_11, %c0_12] : memref<512x128xf32, #tpu.memory_space<vmem>>, vector<512x128xf32>
    tpu.vector_store %arg7[%c0_11, %c0_12], %11 {strides = array<i32>} : memref<512x128xf32, #tpu.memory_space<vmem>>, vector<512x128xf32>,
    return
  }
  func.func @transform_0(%arg0: i32) -> (i32, i32) {
    %c0_i32 = arith.constant 0 : i32
    %c0_i32_0 = arith.constant 0 : i32
    return %arg0, %c0_i32 : i32, i32
  }
  func.func @transform_1(%arg0: i32) -> (i32, i32) {
    %c0_i32 = arith.constant 0 : i32
    %c0_i32_0 = arith.constant 0 : i32
    return %arg0, %c0_i32 : i32, i32
  }
  func.func @transform_2(%arg0: i32) -> (i32, i32) {
    %c0_i32 = arith.constant 0 : i32
    %c0_i32_0 = arith.constant 0 : i32
    return %arg0, %c0_i32 : i32, i32
  }
  func.func @transform_3(%arg0: i32) -> (i32, i32) {
    %c0_i32 = arith.constant 0 : i32
    %c0_i32_0 = arith.constant 0 : i32
    return %arg0, %c0_i32 : i32, i32
  }
  func.func @transform_4(%arg0: i32) -> (i32, i32) {
    %c0_i32 = arith.constant 0 : i32
    %c0_i32_0 = arith.constant 0 : i32
    %c0_i32_1 = arith.constant 0 : i32
    return %c0_i32, %c0_i32_0 : i32, i32
  }
  func.func @transform_5(%arg0: i32) -> (i32, i32) {
    %c0_i32 = arith.constant 0 : i32
    %c0_i32_0 = arith.constant 0 : i32
    %c0_i32_1 = arith.constant 0 : i32
    return %c0_i32, %c0_i32_0 : i32, i32
  }
  func.func @transform_6(%arg0: i32) -> (i32, i32) {
    %c0_i32 = arith.constant 0 : i32
    %c0_i32_0 = arith.constant 0 : i32
    return %arg0, %c0_i32 : i32, i32
  }
}

</mosaic_0001>

<bundles_post_ra>
// kernel: fire_segmentation_forward.5
= control target key start
LH: loop header
LB: loop body
LE: loop exit
PB: predicated region body
PF: predicated region fallthrough
CT: control target
= control target key end

     0   :  { %s1628_s21 = smov 0   ;;  %s1846_s0 = inlined_call_operand.vmem [shape: bf16[512,32], index: 0, kind: input, shape index: {}]   ;;  %s1847_s1 = inlined_call_operand.vmem [shape: bf16[32,128], index: 1, kind: input, shape index: {}]   ;;  %s1848_s2 = inlined_call_operand.vmem [shape: f32[1,128], index: 2, kind: input, shape index: {}, may-alias: {2,4}]   ;;  %s1849_s3 = inlined_call_operand.vmem [shape: bf16[128,128], index: 3, kind: input, shape index: {}]   ;;  %s1850_s4 = inlined_call_operand.vmem [shape: f32[1,128], index: 4, kind: input, shape index: {}, may-alias: {2,4}]   ;;  %s1851_s5 = inlined_call_operand.vmem [shape: bf16[512,128], index: 5, kind: output, shape index: {0}]   ;;  %s1852_s6 = inlined_call_operand.vmem [shape: f32[512,128], index: 6, kind: output, shape index: {1}]  }
   0x1 LB: > { %s1193_s22 = sadd.s32 4294967295, %s1591_s21   ;;  %p1197_p0 = scmp.ge.s32.totalorder %s1591_s21, 1  ;;  %s1591_s21 = sphi %s1628_s21, %s17_s21  }
   0x2   : > { %p216_p1 = scmp.lt.s32.totalorder %s1591_s21, 3 }
   0x4   : > { %p217_p2 = pnand %p1197_p0, %p216_p1 }
   0x5   : > { %s1198_s25 = sshll.u32 (!%p217_p2), %s1193_s22, 5 }
   0x6   : > { %220 = sbr.rel (%p217_p2) target bundleno = 486 (0x1e6), region = 40  ;;  %p252_p3 = scmp.lt.s32.totalorder (!%p217_p2), %s1198_s25, 63 }
   0xb   : > { %v1559_v0 = vld [vmem:[%s1847_s1 + $0x8] sm:$0xff]   ;;  %v1560_v1 = vld [vmem:[%s1847_s1] sm:$0xff]   ;;  %v1577_v2 = vld [vmem:[%s1849_s3 + $0x38] sm:$0xff]   ;;  %s1854_s25 = smov (!%p252_p3, %s1198_s25), 63  ;;  %vm405_vm0 = vcmask 261120  }
   0xc   : > { %1451 = vmatprep.subr.bf16.mxu0 %v1559_v0  ;;  %v1578_v3 = vld [vmem:[%s1849_s3 + $0x30] sm:$0xff]   ;;  %1535 = vmatprep.subr.bf16.mxu1 %v1577_v2  ;;  %s1199_s8 = sshll.u32 %s1854_s25, 2  ;;  %v1579_v4 = vld [vmem:[%s1849_s3 + $0x28] sm:$0xff]   ;;  %v1580_v8 = vld [vmem:[%s1849_s3 + $0x20] sm:$0xff]   ;;  %s1203_s9 = sshll.u32 %s1854_s25, 3 }
   0xd   : > { %1452 = vmatpush3.bf16.msra.mxu0 %v1559_v0  ;;  %1543 = vmatpush3.bf16.msra.mxu1 %v1577_v2  ;;  %s1656_s11 = scalar_lea.vmem %s1846_s0, %s1199_s8  ;;  %v1581_v11 = vld [vmem:[%s1849_s3 + $0x18] sm:$0xff]   ;;  %v1582_v23 = vld [vmem:[%s1849_s3 + $0x10] sm:$0xff]   ;;  %v1583_v24 = vld [vmem:[%s1849_s3 + $0x8] sm:$0xff]   ;;  %s1722_s30 = scalar_lea.vmem %s1851_s5, %s1199_s8 }
   0xe   : > { %1453 = vmatprep.subr.bf16.mxu0 %v1560_v1  ;;  %1536 = vmatprep.subr.bf16.mxu1 %v1578_v3  ;;  %v1561_v5 = vld [vmem:[%s1656_s11] sm:$0xff]   ;;  %v1562_v6 = vld [vmem:[%s1656_s11 + $0x8] sm:$0xff]   ;;  %v1563_v7 = vld [vmem:[%s1656_s11 + $0x10] sm:$0xff]   ;;  %s1778_s12 = scalar_lea.vmem %s1852_s6, %s1203_s9 }
   0xf   : > { %1455 = vmatprep.mubr.msk.bf16.mxu0 %vm405_vm0, %v1561_v5  ;;  %v1564_v9 = vld [vmem:[%s1656_s11 + $0x18] sm:$0xff]   ;;  %v1565_v10 = vld [vmem:[%s1656_s11 + $0x20] sm:$0xff]   ;;  %v1566_v12 = vld [vmem:[%s1656_s11 + $0x28] sm:$0xff]  }
  0x10   : > { %v1567_v13 = vld [vmem:[%s1656_s11 + $0x30] sm:$0xff]   ;;  %v1568_v14 = vld [vmem:[%s1656_s11 + $0x38] sm:$0xff]   ;;  %v1569_v15 = vld [vmem:[%s1656_s11 + $0x40] sm:$0xff]  }
  0x11   : > { %1454 = vmatpush3.bf16.msra.mxu0 %v1560_v1  ;;  %1544 = vmatpush3.bf16.msra.mxu1 %v1578_v3  ;;  %v1570_v16 = vld [vmem:[%s1656_s11 + $0x48] sm:$0xff]   ;;  %v1571_v17 = vld [vmem:[%s1656_s11 + $0x50] sm:$0xff]   ;;  %v1572_v18 = vld [vmem:[%s1656_s11 + $0x58] sm:$0xff]  }
  0x12   : > { %1487 = vmatprep.subr.bf16.mxu0 %v1577_v2  ;;  %1537 = vmatprep.subr.bf16.mxu1 %v1579_v4  ;;  %v1573_v19 = vld [vmem:[%s1656_s11 + $0x60] sm:$0xff]   ;;  %v1574_v20 = vld [vmem:[%s1656_s11 + $0x68] sm:$0xff]   ;;  %v1575_v21 = vld [vmem:[%s1656_s11 + $0x70] sm:$0xff]  }
  0x13   : > { %v1576_v22 = vld [vmem:[%s1656_s11 + $0x78] sm:$0xff]   ;;  %v1584_v25 = vld [vmem:[%s1849_s3] sm:$0xff]  }
  0x14   : > { %1456 = vmatmul.mubr.msk.bf16.vlgmr.msra.gmra.mxu0 %vm405_vm0, %v1562_v6  ;;  %v1711_v27 = vld [vmem:[%s1848_s2] ss:$0 sm:$0xff] }
  0x15   : > { %1459 = vmatprep.mubr.msk.bf16.mxu0 %vm405_vm0, %v1563_v7  ;;  %1488 = vmatpush3.bf16.msra.mxu0 %v1577_v2 }
  0x16   : > { %1489 = vmatprep.subr.bf16.mxu0 %v1578_v3  ;;  %1545 = vmatpush3.bf16.msra.mxu1 %v1579_v4 }
  0x17   : > { %1538 = vmatprep.subr.bf16.mxu1 %v1580_v8 }
  0x19   : > { %1490 = vmatpush3.bf16.msra.mxu0 %v1578_v3 }
  0x1a   : > { %1491 = vmatprep.subr.bf16.mxu0 %v1579_v4  ;;  %1546 = vmatpush3.bf16.msra.mxu1 %v1580_v8 }
  0x1b   : > { %1539 = vmatprep.subr.bf16.mxu1 %v1581_v11 }
  0x1c   : > { %1460 = vmatmul.mubr.msk.bf16.gmra.mxu0 %vm405_vm0, %v1564_v9 }
  0x1d   : > { %1463 = vmatprep.mubr.msk.bf16.mxu0 %vm405_vm0, %v1565_v10  ;;  %1492 = vmatpush3.bf16.msra.mxu0 %v1579_v4 }
  0x1e   : > { %1493 = vmatprep.subr.bf16.mxu0 %v1580_v8  ;;  %1547 = vmatpush3.bf16.msra.mxu1 %v1581_v11 }
  0x1f   : > { %1540 = vmatprep.subr.bf16.mxu1 %v1582_v23 }
  0x21   : > { %1494 = vmatpush3.bf16.msra.mxu0 %v1580_v8 }
  0x22   : > { %1495 = vmatprep.subr.bf16.mxu0 %v1581_v11  ;;  %1548 = vmatpush3.bf16.msra.mxu1 %v1582_v23 }
  0x23   : > { %1541 = vmatprep.subr.bf16.mxu1 %v1583_v24 }
  0x24   : > { %1464 = vmatmul.mubr.msk.bf16.gmra.mxu0 %vm405_vm0, %v1566_v12 }
  0x25   : > { %1467 = vmatprep.mubr.msk.bf16.mxu0 %vm405_vm0, %v1567_v13  ;;  %1496 = vmatpush3.bf16.msra.mxu0 %v1581_v11 }
  0x26   : > { %1497 = vmatprep.subr.bf16.mxu0 %v1582_v23  ;;  %1549 = vmatpush3.bf16.msra.mxu1 %v1583_v24 }
  0x27   : > { %1542 = vmatprep.subr.bf16.mxu1 %v1584_v25 }
  0x29   : > { %1498 = vmatpush3.bf16.msra.mxu0 %v1582_v23 }
  0x2a   : > { %1499 = vmatprep.subr.bf16.mxu0 %v1583_v24  ;;  %1550 = vmatpush3.bf16.msra.mxu1 %v1584_v25 }
  0x2c   : > { %1468 = vmatmul.mubr.msk.bf16.gmra.mxu0 %vm405_vm0, %v1568_v14 }
  0x2d   : > { %1471 = vmatprep.mubr.msk.bf16.mxu0 %vm405_vm0, %v1569_v15  ;;  %1500 = vmatpush3.bf16.msra.mxu0 %v1583_v24 }
  0x2e   : > { %1501 = vmatprep.subr.bf16.mxu0 %v1584_v25 }
  0x31   : > { %1502 = vmatpush3.bf16.msra.mxu0 %v1584_v25 }
  0x34   : > { %1472 = vmatmul.mubr.msk.bf16.gmra.mxu0 %vm405_vm0, %v1570_v16 }
  0x35   : > { %1475 = vmatprep.mubr.msk.bf16.mxu0 %vm405_vm0, %v1571_v17 }
  0x3c   : > { %1476 = vmatmul.mubr.msk.bf16.gmra.mxu0 %vm405_vm0, %v1572_v18 }
  0x3d   : > { %1479 = vmatprep.mubr.msk.bf16.mxu0 %vm405_vm0, %v1573_v19 }
  0x44   : > { %1480 = vmatmul.mubr.msk.bf16.gmra.mxu0 %vm405_vm0, %v1574_v20 }
  0x45   : > { %1483 = vmatprep.mubr.msk.bf16.mxu0 %vm405_vm0, %v1575_v21 }
  0x4c   : > { %1484 = vmatmul.mubr.msk.bf16.gmra.mxu0 %vm405_vm0, %v1576_v22 }
  0xd4   : > { %v1457_v26 = vpop.f32.mrf.mxu0 }
  0xd5   : > { %v497_v29 = vadd.f32 %v1457_v26, %v1711_v27 }
  0xd6   : > { %v488_v28 = vpop.f32.mrf.mxu0 }
  0xd7   : > { %v489_v31 = vadd.f32 %v1711_v27, %v488_v28  ;;  %v617_v34 = vmax.f32 %v497_v29, 0.0 }
  0xd8   : > { %v1458_v30 = vpop.f32.mrf.mxu0 }
  0xd9   : > { %v500_v32 = vadd.f32 %v1458_v30, %v1711_v27  ;;  %v615_v38 = vmax.f32 %v489_v31, 0.0 }
  0xda   : > { %v491_v33 = vpop.f32.mrf.mxu0 }
  0xdb   : > { %v618_v35 = vmax.f32 %v500_v32, 0.0  ;;  %v492_v36 = vadd.f32 %v1711_v27, %v491_v33 }
  0xdc   : > { %v1461_v37 = vpop.f32.mrf.mxu0 }
  0xdd   : > { %v648_v39 = vpack.c.bf16 %v618_v35, %v617_v34  ;;  %v616_v40 = vmax.f32 %v492_v36, 0.0  ;;  %v513_v43 = vadd.f32 %v1461_v37, %v1711_v27 }
  0xde   : > { %v504_v41 = vpop.f32.mrf.mxu0 }
  0xdf   : > { %1394 = vst [vmem:[%s1722_s30 + $0x8] sm:$0xff] %v648_v39   ;;  %v647_v42 = vpack.c.bf16 %v616_v40, %v615_v38  ;;  %v505_v45 = vadd.f32 %v1711_v27, %v504_v41  ;;  %v621_v48 = vmax.f32 %v513_v43, 0.0 }
  0xe0   : > { %v1462_v44 = vpop.f32.mrf.mxu0 }
  0xe1   : > { %1318 = vst [vmem:[%s1722_s30] sm:$0xff] %v647_v42   ;;  %v516_v46 = vadd.f32 %v1462_v44, %v1711_v27  ;;  %1503 = vmatprep.mubr.bf16.mxu0 %v647_v42  ;;  %v619_v52 = vmax.f32 %v505_v45, 0.0 }
  0xe2   : > { %v507_v47 = vpop.f32.mrf.mxu0  ;;  %1504 = vmatmul.mubr.bf16.vlgmr.msra.gmra.mxu0 %v648_v39 }
  0xe3   : > { %v622_v49 = vmax.f32 %v516_v46, 0.0  ;;  %v508_v50 = vadd.f32 %v1711_v27, %v507_v47 }
  0xe4   : > { %v1465_v51 = vpop.f32.mrf.mxu0 }
  0xe5   : > { %v650_v53 = vpack.c.bf16 %v622_v49, %v621_v48  ;;  %v620_v54 = vmax.f32 %v508_v50, 0.0  ;;  %v529_v56 = vadd.f32 %v1465_v51, %v1711_v27 }
  0xe6   : > { %v520_v55 = vpop.f32.mrf.mxu0 }
  0xe7   : > { %1396 = vst [vmem:[%s1722_s30 + $0x18] sm:$0xff] %v650_v53   ;;  %v649_v57 = vpack.c.bf16 %v620_v54, %v619_v52  ;;  %v521_v59 = vadd.f32 %v1711_v27, %v520_v55  ;;  %v625_v62 = vmax.f32 %v529_v56, 0.0 }
  0xe8   : > { %v1466_v58 = vpop.f32.mrf.mxu0 }
  0xe9   : > { %v532_v60 = vadd.f32 %v1466_v58, %v1711_v27  ;;  %1395 = vst [vmem:[%s1722_s30 + $0x10] sm:$0xff] %v649_v57   ;;  %1507 = vmatprep.mubr.bf16.mxu1 %v649_v57  ;;  %v623_v2 = vmax.f32 %v521_v59, 0.0 }
  0xea   : > { %v523_v61 = vpop.f32.mrf.mxu0  ;;  %1508 = vmatmul.mubr.bf16.vlgmr.msra.gmra.mxu1 %v650_v53 }
  0xeb   : > { %v626_v63 = vmax.f32 %v532_v60, 0.0  ;;  %v524_v0 = vadd.f32 %v1711_v27, %v523_v61 }
  0xec   : > { %v1469_v1 = vpop.f32.mrf.mxu0 }
  0xed   : > { %v652_v3 = vpack.c.bf16 %v626_v63, %v625_v62  ;;  %v624_v4 = vmax.f32 %v524_v0, 0.0  ;;  %v545_v7 = vadd.f32 %v1469_v1, %v1711_v27 }
  0xee   : > { %v536_v5 = vpop.f32.mrf.mxu0 }
  0xef   : > { %1398 = vst [vmem:[%s1722_s30 + $0x28] sm:$0xff] %v652_v3   ;;  %v651_v6 = vpack.c.bf16 %v624_v4, %v623_v2  ;;  %v537_v9 = vadd.f32 %v1711_v27, %v536_v5  ;;  %v629_v12 = vmax.f32 %v545_v7, 0.0 }
  0xf0   : > { %v1470_v8 = vpop.f32.mrf.mxu0 }
  0xf1   : > { %1397 = vst [vmem:[%s1722_s30 + $0x20] sm:$0xff] %v651_v6   ;;  %v548_v10 = vadd.f32 %v1470_v8, %v1711_v27  ;;  %1511 = vmatprep.mubr.bf16.mxu1 %v651_v6  ;;  %v627_v16 = vmax.f32 %v537_v9, 0.0 }
  0xf2   : > { %v539_v11 = vpop.f32.mrf.mxu0  ;;  %1512 = vmatmul.mubr.bf16.gmra.mxu1 %v652_v3 }
  0xf3   : > { %v630_v13 = vmax.f32 %v548_v10, 0.0  ;;  %v540_v14 = vadd.f32 %v1711_v27, %v539_v11 }
  0xf4   : > { %v1473_v15 = vpop.f32.mrf.mxu0 }
  0xf5   : > { %v654_v17 = vpack.c.bf16 %v630_v13, %v629_v12  ;;  %v628_v18 = vmax.f32 %v540_v14, 0.0  ;;  %v561_v21 = vadd.f32 %v1473_v15, %v1711_v27  ;;  %v1771_v12 = vld [vmem:[%s1850_s4] ss:$0 sm:$0xff] }
  0xf6   : > { %v552_v19 = vpop.f32.mrf.mxu0 }
  0xf7   : > { %1400 = vst [vmem:[%s1722_s30 + $0x38] sm:$0xff] %v654_v17   ;;  %v653_v20 = vpack.c.bf16 %v628_v18, %v627_v16  ;;  %v553_v23 = vadd.f32 %v1711_v27, %v552_v19  ;;  %v633_v26 = vmax.f32 %v561_v21, 0.0 }
  0xf8   : > { %v1474_v22 = vpop.f32.mrf.mxu0 }
  0xf9   : > { %1399 = vst [vmem:[%s1722_s30 + $0x30] sm:$0xff] %v653_v20   ;;  %v564_v24 = vadd.f32 %v1474_v22, %v1711_v27  ;;  %1515 = vmatprep.mubr.bf16.mxu1 %v653_v20  ;;  %v631_v31 = vmax.f32 %v553_v23, 0.0 }
  0xfa   : > { %v555_v25 = vpop.f32.mrf.mxu0  ;;  %1516 = vmatmul.mubr.bf16.gmra.mxu1 %v654_v17 }
  0xfb   : > { %v634_v28 = vmax.f32 %v564_v24, 0.0  ;;  %v556_v29 = vadd.f32 %v1711_v27, %v555_v25 }
  0xfc   : > { %v1477_v30 = vpop.f32.mrf.mxu0 }
  0xfd   : > { %v656_v32 = vpack.c.bf16 %v634_v28, %v633_v26  ;;  %v632_v33 = vmax.f32 %v556_v29, 0.0  ;;  %v577_v36 = vadd.f32 %v1477_v30, %v1711_v27 }
  0xfe   : > { %v568_v34 = vpop.f32.mrf.mxu0 }
  0xff   : > { %1402 = vst [vmem:[%s1722_s30 + $0x48] sm:$0xff] %v656_v32   ;;  %v655_v35 = vpack.c.bf16 %v632_v33, %v631_v31  ;;  %v569_v38 = vadd.f32 %v1711_v27, %v568_v34  ;;  %v637_v41 = vmax.f32 %v577_v36, 0.0 }
 0x100   : > { %v1478_v37 = vpop.f32.mrf.mxu0 }
 0x101   : > { %1401 = vst [vmem:[%s1722_s30 + $0x40] sm:$0xff] %v655_v35   ;;  %v580_v39 = vadd.f32 %v1478_v37, %v1711_v27  ;;  %1519 = vmatprep.mubr.bf16.mxu1 %v655_v35  ;;  %v635_v45 = vmax.f32 %v569_v38, 0.0 }
 0x102   : > { %v571_v40 = vpop.f32.mrf.mxu0  ;;  %1520 = vmatmul.mubr.bf16.gmra.mxu1 %v656_v32 }
 0x103   : > { %v638_v42 = vmax.f32 %v580_v39, 0.0  ;;  %v572_v43 = vadd.f32 %v1711_v27, %v571_v40 }
 0x104   : > { %v1481_v44 = vpop.f32.mrf.mxu0 }
 0x105   : > { %v658_v46 = vpack.c.bf16 %v638_v42, %v637_v41  ;;  %v636_v47 = vmax.f32 %v572_v43, 0.0  ;;  %v593_v50 = vadd.f32 %v1481_v44, %v1711_v27 }
 0x106   : > { %v584_v48 = vpop.f32.mrf.mxu0 }
 0x107   : > { %1404 = vst [vmem:[%s1722_s30 + $0x58] sm:$0xff] %v658_v46   ;;  %v657_v49 = vpack.c.bf16 %v636_v47, %v635_v45  ;;  %v585_v52 = vadd.f32 %v1711_v27, %v584_v48  ;;  %v641_v55 = vmax.f32 %v593_v50, 0.0 }
 0x108   : > { %v1482_v51 = vpop.f32.mrf.mxu0 }
 0x109   : > { %1403 = vst [vmem:[%s1722_s30 + $0x50] sm:$0xff] %v657_v49   ;;  %v596_v53 = vadd.f32 %v1482_v51, %v1711_v27  ;;  %1523 = vmatprep.mubr.bf16.mxu1 %v657_v49  ;;  %v639_v59 = vmax.f32 %v585_v52, 0.0 }
 0x10a   : > { %v587_v54 = vpop.f32.mrf.mxu0  ;;  %1524 = vmatmul.mubr.bf16.gmra.mxu1 %v658_v46 }
 0x10b   : > { %v642_v56 = vmax.f32 %v596_v53, 0.0  ;;  %v588_v57 = vadd.f32 %v1711_v27, %v587_v54 }
 0x10c   : > { %v1485_v58 = vpop.f32.mrf.mxu0 }
 0x10d   : > { %v660_v60 = vpack.c.bf16 %v642_v56, %v641_v55  ;;  %v640_v61 = vmax.f32 %v588_v57, 0.0  ;;  %v609_v0 = vadd.f32 %v1485_v58, %v1711_v27 }
 0x10e   : > { %v600_v62 = vpop.f32.mrf.mxu0 }
 0x10f   : > { %1406 = vst [vmem:[%s1722_s30 + $0x68] sm:$0xff] %v660_v60   ;;  %v659_v63 = vpack.c.bf16 %v640_v61, %v639_v59  ;;  %v601_v2 = vadd.f32 %v1711_v27, %v600_v62  ;;  %v645_v5 = vmax.f32 %v609_v0, 0.0 }
 0x110   : > { %v1486_v1 = vpop.f32.mrf.mxu0 }
 0x111   : > { %1405 = vst [vmem:[%s1722_s30 + $0x60] sm:$0xff] %v659_v63   ;;  %v612_v3 = vadd.f32 %v1486_v1, %v1711_v27  ;;  %1527 = vmatprep.mubr.bf16.mxu1 %v659_v63  ;;  %v643_v8 = vmax.f32 %v601_v2, 0.0 }
 0x112   : > { %v603_v4 = vpop.f32.mrf.mxu0  ;;  %1528 = vmatmul.mubr.bf16.gmra.mxu1 %v660_v60 }
 0x113   : > { %v646_v6 = vmax.f32 %v612_v3, 0.0  ;;  %v604_v7 = vadd.f32 %v1711_v27, %v603_v4 }
 0x115   : > { %v662_v9 = vpack.c.bf16 %v646_v6, %v645_v5  ;;  %v644_v10 = vmax.f32 %v604_v7, 0.0 }
 0x117   : > { %1408 = vst [vmem:[%s1722_s30 + $0x78] sm:$0xff] %v662_v9   ;;  %v661_v11 = vpack.c.bf16 %v644_v10, %v643_v8 }
 0x119   : > { %1407 = vst [vmem:[%s1722_s30 + $0x70] sm:$0xff] %v661_v11   ;;  %1531 = vmatprep.mubr.bf16.mxu1 %v661_v11 }
 0x11a   : > { %1532 = vmatmul.mubr.bf16.gmra.mxu1 %v662_v9 }
 0x1a2   : > { %v1505_v13 = vpop.f32.mrf.mxu0 }
 0x1a3   : > { %v921_v14 = vadd.f32 %v1505_v13, %v1771_v12 }
 0x1a4   : > { %v912_v27 = vpop.f32.mrf.mxu0 }
 0x1a5   : > { %v1041_v15 = vmax.f32 %v921_v14, 0.0  ;;  %v913_v16 = vadd.f32 %v1771_v12, %v912_v27 }
 0x1a6   : > { %v1506_v17 = vpop.f32.mrf.mxu0 }
 0x1a7   : > { %1073 = vst [vmem:[%s1778_s12 + $0x10] sm:$0xff] %v1041_v15  ;;  %v1039_v18 = vmax.f32 %v913_v16, 0.0  ;;  %v924_v19 = vadd.f32 %v1506_v17, %v1771_v12 }
 0x1a8   : > { %v915_v20 = vpop.f32.mrf.mxu0 }
 0x1a9   : > { %1071 = vst [vmem:[%s1778_s12] sm:$0xff] %v1039_v18  ;;  %v1042_v21 = vmax.f32 %v924_v19, 0.0  ;;  %v916_v22 = vadd.f32 %v1771_v12, %v915_v20 }
 0x1aa   : > { %v1509_v23 = vpop.f32.mrf.mxu1 }
 0x1ab   : > { %1074 = vst [vmem:[%s1778_s12 + $0x18] sm:$0xff] %v1042_v21  ;;  %v1040_v24 = vmax.f32 %v916_v22, 0.0  ;;  %v937_v25 = vadd.f32 %v1509_v23, %v1771_v12 }
 0x1ac   : > { %v928_v26 = vpop.f32.mrf.mxu1 }
 0x1ad   : > { %1072 = vst [vmem:[%s1778_s12 + $0x8] sm:$0xff] %v1040_v24  ;;  %v1045_v28 = vmax.f32 %v937_v25, 0.0  ;;  %v929_v29 = vadd.f32 %v1771_v12, %v928_v26 }
 0x1ae   : > { %v1510_v30 = vpop.f32.mrf.mxu1 }
 0x1af   : > { %1077 = vst [vmem:[%s1778_s12 + $0x30] sm:$0xff] %v1045_v28  ;;  %v1043_v31 = vmax.f32 %v929_v29, 0.0  ;;  %v940_v32 = vadd.f32 %v1510_v30, %v1771_v12 }
 0x1b0   : > { %v931_v33 = vpop.f32.mrf.mxu1 }
 0x1b1   : > { %1075 = vst [vmem:[%s1778_s12 + $0x20] sm:$0xff] %v1043_v31  ;;  %v1046_v34 = vmax.f32 %v940_v32, 0.0  ;;  %v932_v35 = vadd.f32 %v1771_v12, %v931_v33 }
 0x1b2   : > { %v1513_v36 = vpop.f32.mrf.mxu1 }
 0x1b3   : > { %1078 = vst [vmem:[%s1778_s12 + $0x38] sm:$0xff] %v1046_v34  ;;  %v1044_v37 = vmax.f32 %v932_v35, 0.0  ;;  %v953_v38 = vadd.f32 %v1513_v36, %v1771_v12 }
 0x1b4   : > { %v944_v39 = vpop.f32.mrf.mxu1 }
 0x1b5   : > { %1076 = vst [vmem:[%s1778_s12 + $0x28] sm:$0xff] %v1044_v37  ;;  %v1049_v40 = vmax.f32 %v953_v38, 0.0  ;;  %v945_v41 = vadd.f32 %v1771_v12, %v944_v39 }
 0x1b6   : > { %v1514_v42 = vpop.f32.mrf.mxu1 }
 0x1b7   : > { %1081 = vst [vmem:[%s1778_s12 + $0x50] sm:$0xff] %v1049_v40  ;;  %v1047_v43 = vmax.f32 %v945_v41, 0.0  ;;  %v956_v44 = vadd.f32 %v1514_v42, %v1771_v12 }
 0x1b8   : > { %v947_v45 = vpop.f32.mrf.mxu1 }
 0x1b9   : > { %1079 = vst [vmem:[%s1778_s12 + $0x40] sm:$0xff] %v1047_v43  ;;  %v1050_v46 = vmax.f32 %v956_v44, 0.0  ;;  %v948_v47 = vadd.f32 %v1771_v12, %v947_v45 }
 0x1ba   : > { %v1517_v48 = vpop.f32.mrf.mxu1 }
 0x1bb   : > { %1082 = vst [vmem:[%s1778_s12 + $0x58] sm:$0xff] %v1050_v46  ;;  %v1048_v49 = vmax.f32 %v948_v47, 0.0  ;;  %v969_v50 = vadd.f32 %v1517_v48, %v1771_v12 }
 0x1bc   : > { %v960_v51 = vpop.f32.mrf.mxu1 }
 0x1bd   : > { %1080 = vst [vmem:[%s1778_s12 + $0x48] sm:$0xff] %v1048_v49  ;;  %v1053_v52 = vmax.f32 %v969_v50, 0.0  ;;  %v961_v53 = vadd.f32 %v1771_v12, %v960_v51 }
 0x1be   : > { %v1518_v54 = vpop.f32.mrf.mxu1 }
 0x1bf   : > { %1085 = vst [vmem:[%s1778_s12 + $0x70] sm:$0xff] %v1053_v52  ;;  %v1051_v55 = vmax.f32 %v961_v53, 0.0  ;;  %v972_v56 = vadd.f32 %v1518_v54, %v1771_v12 }
 0x1c0   : > { %v963_v57 = vpop.f32.mrf.mxu1 }
 0x1c1   : > { %1083 = vst [vmem:[%s1778_s12 + $0x60] sm:$0xff] %v1051_v55  ;;  %v1054_v58 = vmax.f32 %v972_v56, 0.0  ;;  %v964_v59 = vadd.f32 %v1771_v12, %v963_v57 }
 0x1c2   : > { %v1521_v60 = vpop.f32.mrf.mxu1 }
 0x1c3   : > { %1086 = vst [vmem:[%s1778_s12 + $0x78] sm:$0xff] %v1054_v58  ;;  %v1052_v61 = vmax.f32 %v964_v59, 0.0  ;;  %v985_v62 = vadd.f32 %v1521_v60, %v1771_v12 }
 0x1c4   : > { %v976_v63 = vpop.f32.mrf.mxu1 }
 0x1c5   : > { %1084 = vst [vmem:[%s1778_s12 + $0x68] sm:$0xff] %v1052_v61  ;;  %v1057_v0 = vmax.f32 %v985_v62, 0.0  ;;  %v977_v1 = vadd.f32 %v1771_v12, %v976_v63 }
 0x1c6   : > { %v1522_v2 = vpop.f32.mrf.mxu1 }
 0x1c7   : > { %1089 = vst [vmem:[%s1778_s12 + $0x90] sm:$0xff] %v1057_v0  ;;  %v1055_v3 = vmax.f32 %v977_v1, 0.0  ;;  %v988_v4 = vadd.f32 %v1522_v2, %v1771_v12 }
 0x1c8   : > { %v979_v5 = vpop.f32.mrf.mxu1 }
 0x1c9   : > { %1087 = vst [vmem:[%s1778_s12 + $0x80] sm:$0xff] %v1055_v3  ;;  %v1058_v6 = vmax.f32 %v988_v4, 0.0  ;;  %v980_v7 = vadd.f32 %v1771_v12, %v979_v5 }
 0x1ca   : > { %v1525_v8 = vpop.f32.mrf.mxu1 }
 0x1cb   : > { %1090 = vst [vmem:[%s1778_s12 + $0x98] sm:$0xff] %v1058_v6  ;;  %v1056_v9 = vmax.f32 %v980_v7, 0.0  ;;  %v1001_v10 = vadd.f32 %v1525_v8, %v1771_v12 }
 0x1cc   : > { %v992_v11 = vpop.f32.mrf.mxu1 }
 0x1cd   : > { %1088 = vst [vmem:[%s1778_s12 + $0x88] sm:$0xff] %v1056_v9  ;;  %v1061_v13 = vmax.f32 %v1001_v10, 0.0  ;;  %v993_v14 = vadd.f32 %v1771_v12, %v992_v11 }
 0x1ce   : > { %v1526_v27 = vpop.f32.mrf.mxu1 }
 0x1cf   : > { %1093 = vst [vmem:[%s1778_s12 + $0xb0] sm:$0xff] %v1061_v13  ;;  %v1059_v15 = vmax.f32 %v993_v14, 0.0  ;;  %v1004_v16 = vadd.f32 %v1526_v27, %v1771_v12 }
 0x1d0   : > { %v995_v17 = vpop.f32.mrf.mxu1 }
 0x1d1   : > { %1091 = vst [vmem:[%s1778_s12 + $0xa0] sm:$0xff] %v1059_v15  ;;  %v1062_v18 = vmax.f32 %v1004_v16, 0.0  ;;  %v996_v19 = vadd.f32 %v1771_v12, %v995_v17 }
 0x1d2   : > { %v1529_v20 = vpop.f32.mrf.mxu1 }
 0x1d3   : > { %1094 = vst [vmem:[%s1778_s12 + $0xb8] sm:$0xff] %v1062_v18  ;;  %v1060_v21 = vmax.f32 %v996_v19, 0.0  ;;  %v1017_v22 = vadd.f32 %v1529_v20, %v1771_v12 }
 0x1d4   : > { %v1008_v23 = vpop.f32.mrf.mxu1 }
 0x1d5   : > { %1092 = vst [vmem:[%s1778_s12 + $0xa8] sm:$0xff] %v1060_v21  ;;  %v1065_v24 = vmax.f32 %v1017_v22, 0.0  ;;  %v1009_v25 = vadd.f32 %v1771_v12, %v1008_v23 }
 0x1d6   : > { %v1530_v26 = vpop.f32.mrf.mxu1 }
 0x1d7   : > { %1097 = vst [vmem:[%s1778_s12 + $0xd0] sm:$0xff] %v1065_v24  ;;  %v1063_v28 = vmax.f32 %v1009_v25, 0.0  ;;  %v1020_v29 = vadd.f32 %v1530_v26, %v1771_v12 }
 0x1d8   : > { %v1011_v30 = vpop.f32.mrf.mxu1 }
 0x1d9   : > { %1095 = vst [vmem:[%s1778_s12 + $0xc0] sm:$0xff] %v1063_v28  ;;  %v1066_v31 = vmax.f32 %v1020_v29, 0.0  ;;  %v1012_v32 = vadd.f32 %v1771_v12, %v1011_v30 }
 0x1da   : > { %v1533_v33 = vpop.f32.mrf.mxu1 }
 0x1db   : > { %1098 = vst [vmem:[%s1778_s12 + $0xd8] sm:$0xff] %v1066_v31  ;;  %v1064_v34 = vmax.f32 %v1012_v32, 0.0  ;;  %v1033_v35 = vadd.f32 %v1533_v33, %v1771_v12 }
 0x1dc   : > { %v1024_v36 = vpop.f32.mrf.mxu1 }
 0x1dd   : > { %1096 = vst [vmem:[%s1778_s12 + $0xc8] sm:$0xff] %v1064_v34  ;;  %v1069_v37 = vmax.f32 %v1033_v35, 0.0  ;;  %v1025_v38 = vadd.f32 %v1771_v12, %v1024_v36 }
 0x1de   : > { %v1534_v39 = vpop.f32.mrf.mxu1 }
 0x1df   : > { %1101 = vst [vmem:[%s1778_s12 + $0xf0] sm:$0xff] %v1069_v37  ;;  %v1067_v40 = vmax.f32 %v1025_v38, 0.0  ;;  %v1036_v41 = vadd.f32 %v1534_v39, %v1771_v12 }
 0x1e0   : > { %v1027_v42 = vpop.f32.mrf.mxu1 }
 0x1e1   : > { %1099 = vst [vmem:[%s1778_s12 + $0xe0] sm:$0xff] %v1067_v40  ;;  %v1070_v43 = vmax.f32 %v1036_v41, 0.0  ;;  %v1028_v44 = vadd.f32 %v1771_v12, %v1027_v42 }
 0x1e3   : > { %1102 = vst [vmem:[%s1778_s12 + $0xf8] sm:$0xff] %v1070_v43  ;;  %v1068_v45 = vmax.f32 %v1028_v44, 0.0 }
 0x1e5   : > { %1100 = vst [vmem:[%s1778_s12 + $0xe8] sm:$0xff] %v1068_v45 }
 0x1e6 PF: > { %s17_s21 = sadd.s32 1, %s1591_s21  }
 0x1e7   : > { %p14_p4 = scmp.ge.s32.totalorder %s17_s21, 4  }
 0x1e9   :  { %16 = sbr.rel (!%p14_p4) target bundleno = 1 (0x1), region = 82 }

// kernel: fire_segmentation_forward.6
= control target key start
LH: loop header
LB: loop body
LE: loop exit
PB: predicated region body
PF: predicated region fallthrough
CT: control target
= control target key end

     0   :  { %vm126_vm0 = vcmask 654336   ;;  %s972_s1 = inlined_call_operand.vmem [shape: bf16[80,128], index: 1, kind: input, shape index: {}]   ;;  %s973_s0 = inlined_call_operand.vmem [shape: bf16[128,80], index: 0, kind: input, shape index: {}]   ;;  %s974_s3 = inlined_call_operand.vmem [shape: bf16[128,128], index: 3, kind: input, shape index: {}]   ;;  %s975_s2 = inlined_call_operand.vmem [shape: f32[1,128], index: 2, kind: input, shape index: {}, may-alias: {2,4}]   ;;  %s976_s5 = inlined_call_operand.vmem [shape: bf16[128,128], index: 5, kind: output, shape index: {0}]   ;;  %s977_s4 = inlined_call_operand.vmem [shape: f32[1,128], index: 4, kind: input, shape index: {}, may-alias: {2,4}]   ;;  %s978_s6 = inlined_call_operand.vmem [shape: f32[128,128], index: 6, kind: output, shape index: {1}]  }
   0x1   :  { %v749_v0 = vld [vmem:[%s972_s1 + $0x20] sm:$0xff]   ;;  %v750_v1 = vld [vmem:[%s972_s1 + $0x18] sm:$0xff]   ;;  %v751_v2 = vld [vmem:[%s972_s1 + $0x10] sm:$0xff]  }
   0x2   :  { %691 = vmatprep.subr.bf16.mxu0 %v749_v0  ;;  %v754_v3 = vld [vmem:[%s973_s0] sm:$0xff]   ;;  %v752_v4 = vld [vmem:[%s972_s1 + $0x8] sm:$0xff]   ;;  %v762_v6 = vld [vmem:[%s974_s3 + $0x38] sm:$0xff]  }
   0x3   :  { %692 = vmatpush3.bf16.msra.mxu0 %v749_v0  ;;  %701 = vmatprep.mubr.msk.bf16.mxu0 %vm126_vm0, %v754_v3  ;;  %v753_v5 = vld [vmem:[%s972_s1] sm:$0xff]   ;;  %v763_v7 = vld [vmem:[%s974_s3 + $0x30] sm:$0xff]   ;;  %v755_v8 = vld [vmem:[%s973_s0 + $0x8] sm:$0xff]  }
   0x4   :  { %693 = vmatprep.subr.bf16.mxu0 %v750_v1  ;;  %717 = vmatprep.subr.bf16.mxu1 %v762_v6  ;;  %v756_v9 = vld [vmem:[%s973_s0 + $0x10] sm:$0xff]   ;;  %v764_v10 = vld [vmem:[%s974_s3 + $0x28] sm:$0xff]   ;;  %v765_v11 = vld [vmem:[%s974_s3 + $0x20] sm:$0xff]  }
   0x5   :  { %718 = vmatpush3.bf16.msra.mxu1 %v762_v6  ;;  %v766_v12 = vld [vmem:[%s974_s3 + $0x18] sm:$0xff]   ;;  %v758_v14 = vld [vmem:[%s973_s0 + $0x20] sm:$0xff]   ;;  %v759_v15 = vld [vmem:[%s973_s0 + $0x28] sm:$0xff]  }
   0x6   :  { %719 = vmatprep.subr.bf16.mxu1 %v763_v7  ;;  %v757_v13 = vld [vmem:[%s973_s0 + $0x18] sm:$0xff]   ;;  %v760_v16 = vld [vmem:[%s973_s0 + $0x30] sm:$0xff]   ;;  %v768_v19 = vld [vmem:[%s974_s3 + $0x8] sm:$0xff]  }
   0x7   :  { %694 = vmatpush3.bf16.msra.mxu0 %v750_v1  ;;  %v761_v17 = vld [vmem:[%s973_s0 + $0x38] sm:$0xff]   ;;  %v767_v18 = vld [vmem:[%s974_s3 + $0x10] sm:$0xff]   ;;  %v769_v20 = vld [vmem:[%s974_s3] sm:$0xff]  }
   0x8   :  { %695 = vmatprep.subr.bf16.mxu0 %v751_v2  ;;  %v879_v22 = vld [vmem:[%s975_s2] ss:$0 sm:$0xff] }
   0x9   :  { %720 = vmatpush3.bf16.msra.mxu1 %v763_v7 }
   0xa   :  { %721 = vmatprep.subr.bf16.mxu1 %v764_v10 }
   0xb   :  { %696 = vmatpush3.bf16.msra.mxu0 %v751_v2 }
   0xc   :  { %697 = vmatprep.subr.bf16.mxu0 %v752_v4 }
   0xd   :  { %722 = vmatpush3.bf16.msra.mxu1 %v764_v10 }
   0xe   :  { %723 = vmatprep.subr.bf16.mxu1 %v765_v11 }
   0xf   :  { %698 = vmatpush3.bf16.msra.mxu0 %v752_v4 }
  0x10   :  { %699 = vmatprep.subr.bf16.mxu0 %v753_v5 }
  0x11   :  { %724 = vmatpush3.bf16.msra.mxu1 %v765_v11 }
  0x12   :  { %725 = vmatprep.subr.bf16.mxu1 %v766_v12 }
  0x13   :  { %700 = vmatpush3.bf16.msra.mxu0 %v753_v5 }
  0x15   :  { %726 = vmatpush3.bf16.msra.mxu1 %v766_v12 }
  0x16   :  { %702 = vmatmul.mubr.msk.bf16.vlgmr.msra.gmra.mxu0 %vm126_vm0, %v755_v8  ;;  %727 = vmatprep.subr.bf16.mxu1 %v767_v18 }
  0x17   :  { %705 = vmatprep.mubr.msk.bf16.mxu0 %vm126_vm0, %v756_v9 }
  0x19   :  { %728 = vmatpush3.bf16.msra.mxu1 %v767_v18 }
  0x1a   :  { %729 = vmatprep.subr.bf16.mxu1 %v768_v19 }
  0x1d   :  { %730 = vmatpush3.bf16.msra.mxu1 %v768_v19 }
  0x1e   :  { %706 = vmatmul.mubr.msk.bf16.gmra.mxu0 %vm126_vm0, %v757_v13  ;;  %731 = vmatprep.subr.bf16.mxu1 %v769_v20 }
  0x1f   :  { %709 = vmatprep.mubr.msk.bf16.mxu0 %vm126_vm0, %v758_v14  ;;  %v590_v14 = vld [vmem:[%s977_s4] ss:$0 sm:$0xff] }
  0x21   :  { %732 = vmatpush3.bf16.msra.mxu1 %v769_v20 }
  0x26   :  { %710 = vmatmul.mubr.msk.bf16.gmra.mxu0 %vm126_vm0, %v759_v15 }
  0x27   :  { %713 = vmatprep.mubr.msk.bf16.mxu0 %vm126_vm0, %v760_v16 }
  0x2e   :  { %714 = vmatmul.mubr.msk.bf16.gmra.mxu0 %vm126_vm0, %v761_v17 }
  0xd6   :  { %v703_v21 = vpop.f32.mrf.mxu0 }
  0xd7   :  { %v194_v24 = vadd.f32 %v703_v21, %v879_v22 }
  0xd8   :  { %v185_v23 = vpop.f32.mrf.mxu0 }
  0xd9   :  { %v186_v26 = vadd.f32 %v879_v22, %v185_v23  ;;  %v250_v29 = vmax.f32 %v194_v24, 0.0 }
  0xda   :  { %v704_v25 = vpop.f32.mrf.mxu0 }
  0xdb   :  { %v197_v27 = vadd.f32 %v704_v25, %v879_v22  ;;  %v248_v33 = vmax.f32 %v186_v26, 0.0 }
  0xdc   :  { %v188_v28 = vpop.f32.mrf.mxu0 }
  0xdd   :  { %v251_v30 = vmax.f32 %v197_v27, 0.0  ;;  %v189_v31 = vadd.f32 %v879_v22, %v188_v28 }
  0xde   :  { %v707_v32 = vpop.f32.mrf.mxu0 }
  0xdf   :  { %v265_v34 = vpack.c.bf16 %v251_v30, %v250_v29  ;;  %v249_v35 = vmax.f32 %v189_v31, 0.0  ;;  %v210_v37 = vadd.f32 %v707_v32, %v879_v22 }
  0xe0   :  { %v201_v36 = vpop.f32.mrf.mxu0 }
  0xe1   :  { %655 = vst [vmem:[%s976_s5 + $0x8] sm:$0xff] %v265_v34   ;;  %v264_v38 = vpack.c.bf16 %v249_v35, %v248_v33  ;;  %v202_v40 = vadd.f32 %v879_v22, %v201_v36  ;;  %v254_v43 = vmax.f32 %v210_v37, 0.0 }
  0xe2   :  { %v708_v39 = vpop.f32.mrf.mxu0 }
  0xe3   :  { %v213_v41 = vadd.f32 %v708_v39, %v879_v22  ;;  %619 = vst [vmem:[%s976_s5] sm:$0xff] %v264_v38   ;;  %733 = vmatprep.mubr.bf16.mxu1 %v264_v38  ;;  %v252_v47 = vmax.f32 %v202_v40, 0.0 }
  0xe4   :  { %v204_v42 = vpop.f32.mrf.mxu0  ;;  %734 = vmatmul.mubr.bf16.vlgmr.msra.gmra.mxu1 %v265_v34 }
  0xe5   :  { %v255_v44 = vmax.f32 %v213_v41, 0.0  ;;  %v205_v45 = vadd.f32 %v879_v22, %v204_v42 }
  0xe6   :  { %v711_v46 = vpop.f32.mrf.mxu0 }
  0xe7   :  { %v267_v48 = vpack.c.bf16 %v255_v44, %v254_v43  ;;  %v253_v49 = vmax.f32 %v205_v45, 0.0  ;;  %v226_v52 = vadd.f32 %v711_v46, %v879_v22 }
  0xe8   :  { %v217_v50 = vpop.f32.mrf.mxu0 }
  0xe9   :  { %657 = vst [vmem:[%s976_s5 + $0x18] sm:$0xff] %v267_v48   ;;  %v266_v51 = vpack.c.bf16 %v253_v49, %v252_v47  ;;  %v218_v54 = vadd.f32 %v879_v22, %v217_v50  ;;  %v258_v57 = vmax.f32 %v226_v52, 0.0 }
  0xea   :  { %v712_v53 = vpop.f32.mrf.mxu0 }
  0xeb   :  { %656 = vst [vmem:[%s976_s5 + $0x10] sm:$0xff] %v266_v51   ;;  %v229_v55 = vadd.f32 %v712_v53, %v879_v22  ;;  %737 = vmatprep.mubr.bf16.mxu1 %v266_v51  ;;  %v256_v61 = vmax.f32 %v218_v54, 0.0 }
  0xec   :  { %v220_v56 = vpop.f32.mrf.mxu0  ;;  %738 = vmatmul.mubr.bf16.gmra.mxu1 %v267_v48 }
  0xed   :  { %v259_v58 = vmax.f32 %v229_v55, 0.0  ;;  %v221_v59 = vadd.f32 %v879_v22, %v220_v56 }
  0xee   :  { %v715_v60 = vpop.f32.mrf.mxu0 }
  0xef   :  { %v269_v62 = vpack.c.bf16 %v259_v58, %v258_v57  ;;  %v257_v63 = vmax.f32 %v221_v59, 0.0  ;;  %v242_v2 = vadd.f32 %v715_v60, %v879_v22 }
  0xf0   :  { %v233_v0 = vpop.f32.mrf.mxu0 }
  0xf1   :  { %659 = vst [vmem:[%s976_s5 + $0x28] sm:$0xff] %v269_v62   ;;  %v268_v1 = vpack.c.bf16 %v257_v63, %v256_v61  ;;  %v234_v4 = vadd.f32 %v879_v22, %v233_v0  ;;  %v262_v7 = vmax.f32 %v242_v2, 0.0 }
  0xf2   :  { %v716_v3 = vpop.f32.mrf.mxu0 }
  0xf3   :  { %658 = vst [vmem:[%s976_s5 + $0x20] sm:$0xff] %v268_v1   ;;  %v245_v5 = vadd.f32 %v716_v3, %v879_v22  ;;  %741 = vmatprep.mubr.bf16.mxu1 %v268_v1  ;;  %v260_v10 = vmax.f32 %v234_v4, 0.0 }
  0xf4   :  { %v236_v6 = vpop.f32.mrf.mxu0  ;;  %742 = vmatmul.mubr.bf16.gmra.mxu1 %v269_v62 }
  0xf5   :  { %v263_v8 = vmax.f32 %v245_v5, 0.0  ;;  %v237_v9 = vadd.f32 %v879_v22, %v236_v6 }
  0xf7   :  { %v271_v11 = vpack.c.bf16 %v263_v8, %v262_v7  ;;  %v261_v12 = vmax.f32 %v237_v9, 0.0 }
  0xf9   :  { %661 = vst [vmem:[%s976_s5 + $0x38] sm:$0xff] %v271_v11   ;;  %v270_v13 = vpack.c.bf16 %v261_v12, %v260_v10 }
  0xfb   :  { %660 = vst [vmem:[%s976_s5 + $0x30] sm:$0xff] %v270_v13   ;;  %745 = vmatprep.mubr.bf16.mxu1 %v270_v13 }
  0xfc   :  { %746 = vmatmul.mubr.bf16.gmra.mxu1 %v271_v11 }
 0x1a4   :  { %v735_v15 = vpop.f32.mrf.mxu1 }
 0x1a5   :  { %v458_v16 = vadd.f32 %v735_v15, %v590_v14 }
 0x1a6   :  { %v449_v17 = vpop.f32.mrf.mxu1 }
 0x1a7   :  { %v514_v18 = vmax.f32 %v458_v16, 0.0  ;;  %v450_v19 = vadd.f32 %v590_v14, %v449_v17 }
 0x1a8   :  { %v736_v20 = vpop.f32.mrf.mxu1 }
 0x1a9   :  { %530 = vst [vmem:[%s978_s6 + $0x10] sm:$0xff] %v514_v18  ;;  %v512_v21 = vmax.f32 %v450_v19, 0.0  ;;  %v461_v22 = vadd.f32 %v736_v20, %v590_v14 }
 0x1aa   :  { %v452_v23 = vpop.f32.mrf.mxu1 }
 0x1ab   :  { %528 = vst [vmem:[%s978_s6] sm:$0xff] %v512_v21  ;;  %v515_v24 = vmax.f32 %v461_v22, 0.0  ;;  %v453_v25 = vadd.f32 %v590_v14, %v452_v23 }
 0x1ac   :  { %v739_v26 = vpop.f32.mrf.mxu1 }
 0x1ad   :  { %531 = vst [vmem:[%s978_s6 + $0x18] sm:$0xff] %v515_v24  ;;  %v513_v27 = vmax.f32 %v453_v25, 0.0  ;;  %v474_v28 = vadd.f32 %v739_v26, %v590_v14 }
 0x1ae   :  { %v465_v29 = vpop.f32.mrf.mxu1 }
 0x1af   :  { %529 = vst [vmem:[%s978_s6 + $0x8] sm:$0xff] %v513_v27  ;;  %v518_v30 = vmax.f32 %v474_v28, 0.0  ;;  %v466_v31 = vadd.f32 %v590_v14, %v465_v29 }
 0x1b0   :  { %v740_v32 = vpop.f32.mrf.mxu1 }
 0x1b1   :  { %534 = vst [vmem:[%s978_s6 + $0x30] sm:$0xff] %v518_v30  ;;  %v516_v33 = vmax.f32 %v466_v31, 0.0  ;;  %v477_v34 = vadd.f32 %v740_v32, %v590_v14 }
 0x1b2   :  { %v468_v35 = vpop.f32.mrf.mxu1 }
 0x1b3   :  { %532 = vst [vmem:[%s978_s6 + $0x20] sm:$0xff] %v516_v33  ;;  %v519_v36 = vmax.f32 %v477_v34, 0.0  ;;  %v469_v37 = vadd.f32 %v590_v14, %v468_v35 }
 0x1b4   :  { %v743_v38 = vpop.f32.mrf.mxu1 }
 0x1b5   :  { %535 = vst [vmem:[%s978_s6 + $0x38] sm:$0xff] %v519_v36  ;;  %v517_v39 = vmax.f32 %v469_v37, 0.0  ;;  %v490_v40 = vadd.f32 %v743_v38, %v590_v14 }
 0x1b6   :  { %v481_v41 = vpop.f32.mrf.mxu1 }
 0x1b7   :  { %533 = vst [vmem:[%s978_s6 + $0x28] sm:$0xff] %v517_v39  ;;  %v522_v42 = vmax.f32 %v490_v40, 0.0  ;;  %v482_v43 = vadd.f32 %v590_v14, %v481_v41 }
 0x1b8   :  { %v744_v44 = vpop.f32.mrf.mxu1 }
 0x1b9   :  { %538 = vst [vmem:[%s978_s6 + $0x50] sm:$0xff] %v522_v42  ;;  %v520_v45 = vmax.f32 %v482_v43, 0.0  ;;  %v493_v46 = vadd.f32 %v744_v44, %v590_v14 }
 0x1ba   :  { %v484_v47 = vpop.f32.mrf.mxu1 }
 0x1bb   :  { %536 = vst [vmem:[%s978_s6 + $0x40] sm:$0xff] %v520_v45  ;;  %v523_v48 = vmax.f32 %v493_v46, 0.0  ;;  %v485_v49 = vadd.f32 %v590_v14, %v484_v47 }
 0x1bc   :  { %v747_v50 = vpop.f32.mrf.mxu1 }
 0x1bd   :  { %539 = vst [vmem:[%s978_s6 + $0x58] sm:$0xff] %v523_v48  ;;  %v521_v51 = vmax.f32 %v485_v49, 0.0  ;;  %v506_v52 = vadd.f32 %v747_v50, %v590_v14 }
 0x1be   :  { %v497_v53 = vpop.f32.mrf.mxu1 }
 0x1bf   :  { %537 = vst [vmem:[%s978_s6 + $0x48] sm:$0xff] %v521_v51  ;;  %v526_v54 = vmax.f32 %v506_v52, 0.0  ;;  %v498_v55 = vadd.f32 %v590_v14, %v497_v53 }
 0x1c0   :  { %v748_v56 = vpop.f32.mrf.mxu1 }
 0x1c1   :  { %542 = vst [vmem:[%s978_s6 + $0x70] sm:$0xff] %v526_v54  ;;  %v524_v57 = vmax.f32 %v498_v55, 0.0  ;;  %v509_v58 = vadd.f32 %v748_v56, %v590_v14 }
 0x1c2   :  { %v500_v59 = vpop.f32.mrf.mxu1 }
 0x1c3   :  { %540 = vst [vmem:[%s978_s6 + $0x60] sm:$0xff] %v524_v57  ;;  %v527_v60 = vmax.f32 %v509_v58, 0.0  ;;  %v501_v61 = vadd.f32 %v590_v14, %v500_v59 }
 0x1c5   :  { %543 = vst [vmem:[%s978_s6 + $0x78] sm:$0xff] %v527_v60  ;;  %v525_v62 = vmax.f32 %v501_v61, 0.0 }
 0x1c7   :  { %541 = vst [vmem:[%s978_s6 + $0x68] sm:$0xff] %v525_v62 }

// kernel: fire_segmentation_forward.7
= control target key start
LH: loop header
LB: loop body
LE: loop exit
PB: predicated region body
PF: predicated region fallthrough
CT: control target
= control target key end

     0   :  { %v438_v0 = vmov 0   ;;  %vm124_vm0 = vcmask 130048   ;;  %s563_s1 = inlined_call_operand.vmem [shape: bf16[144,128], index: 1, kind: input, shape index: {}]   ;;  %s564_s0 = inlined_call_operand.vmem [shape: bf16[32,144], index: 0, kind: input, shape index: {}]   ;;  %s565_s3 = inlined_call_operand.vmem [shape: bf16[128,128], index: 3, kind: input, shape index: {}]   ;;  %s566_s2 = inlined_call_operand.vmem [shape: f32[1,128], index: 2, kind: input, shape index: {}, may-alias: {2,4}]   ;;  %s567_s5 = inlined_call_operand.vmem [shape: bf16[32,128], index: 5, kind: output, shape index: {0}]   ;;  %s568_s4 = inlined_call_operand.vmem [shape: f32[1,128], index: 4, kind: input, shape index: {}, may-alias: {2,4}]   ;;  %s569_s6 = inlined_call_operand.vmem [shape: f32[32,128], index: 6, kind: output, shape index: {1}]  }
   0x1   :  { %131 = vmatprep.subr.bf16.mxu0 %v438_v0  ;;  %v415_v1 = vld [vmem:[%s563_s1 + $0x38] sm:$0xff]   ;;  %v416_v2 = vld [vmem:[%s563_s1 + $0x30] sm:$0xff]   ;;  %v417_v3 = vld [vmem:[%s563_s1 + $0x28] sm:$0xff]  }
   0x2   :  { %132 = vmatpush1.bf16.msra.mxu0 %v415_v1  ;;  %v418_v4 = vld [vmem:[%s563_s1 + $0x20] sm:$0xff]   ;;  %v430_v6 = vld [vmem:[%s565_s3 + $0x38] sm:$0xff]   ;;  %v431_v7 = vld [vmem:[%s565_s3 + $0x30] sm:$0xff]  }
   0x3   :  { %133 = vmatprep.subr.bf16.mxu0 %v438_v0  ;;  %v426_v5 = vld [vmem:[%s564_s0 + $0x4] ss:$8 sps:$4 sm:$0xff]   ;;  %v419_v8 = vld [vmem:[%s563_s1 + $0x18] sm:$0xff]   ;;  %394 = vmatprep.subr.bf16.mxu1 %v430_v6  ;;  %v420_v10 = vld [vmem:[%s563_s1 + $0x10] sm:$0xff]  }
   0x4   :  { %354 = vmatprep.mubr.msk.bf16.mxu0 %vm124_vm0, %v426_v5  ;;  %395 = vmatpush3.bf16.msra.mxu1 %v430_v6  ;;  %v432_v9 = vld [vmem:[%s565_s3 + $0x28] sm:$0xff]   ;;  %v433_v11 = vld [vmem:[%s565_s3 + $0x20] sm:$0xff]   ;;  %v427_v16 = vld [vmem:[%s564_s0 + $0x14] ss:$8 sps:$4 sm:$0xff]  }
   0x5   :  { %396 = vmatprep.subr.bf16.mxu1 %v431_v7  ;;  %v421_v12 = vld [vmem:[%s563_s1 + $0x8] sm:$0xff]   ;;  %v422_v13 = vld [vmem:[%s563_s1] sm:$0xff]   ;;  %v429_v17 = vld [vmem:[%s564_s0 + $0x10] ss:$8 sps:$4 sm:$0xff]  }
   0x6   :  { %134 = vmatpush1.bf16.msra.mxu0 %v416_v2  ;;  %v423_v14 = vld [vmem:[%s563_s1 + $0x40] sm:$0xff]   ;;  %v434_v18 = vld [vmem:[%s565_s3 + $0x18] sm:$0xff]   ;;  %v435_v19 = vld [vmem:[%s565_s3 + $0x10] sm:$0xff]  }
   0x7   :  { %135 = vmatprep.subr.bf16.mxu0 %v438_v0  ;;  %v424_v15 = vld [vmem:[%s564_s0] ss:$8 sps:$4 sm:$0xff]  }
   0x8   :  { %397 = vmatpush3.bf16.msra.mxu1 %v431_v7  ;;  %v436_v20 = vld [vmem:[%s565_s3 + $0x8] sm:$0xff]   ;;  %v437_v21 = vld [vmem:[%s565_s3] sm:$0xff]  }
   0x9   :  { %398 = vmatprep.subr.bf16.mxu1 %v432_v9  ;;  %v340_v22 = vld [vmem:[%s566_s2] ss:$0 sm:$0xff] }
   0xa   :  { %136 = vmatpush1.bf16.msra.mxu0 %v417_v3  ;;  %v360_v41 = vld [vmem:[%s568_s4] ss:$0 sm:$0xff] }
   0xb   :  { %137 = vmatprep.subr.bf16.mxu0 %v438_v0 }
   0xc   :  { %399 = vmatpush3.bf16.msra.mxu1 %v432_v9 }
   0xd   :  { %400 = vmatprep.subr.bf16.mxu1 %v433_v11 }
   0xe   :  { %138 = vmatpush1.bf16.msra.mxu0 %v418_v4 }
   0xf   :  { %139 = vmatprep.subr.bf16.mxu0 %v438_v0 }
  0x10   :  { %401 = vmatpush3.bf16.msra.mxu1 %v433_v11 }
  0x11   :  { %402 = vmatprep.subr.bf16.mxu1 %v434_v18 }
  0x12   :  { %140 = vmatpush1.bf16.msra.mxu0 %v419_v8 }
  0x13   :  { %141 = vmatprep.subr.bf16.mxu0 %v438_v0 }
  0x14   :  { %403 = vmatpush3.bf16.msra.mxu1 %v434_v18 }
  0x15   :  { %404 = vmatprep.subr.bf16.mxu1 %v435_v19 }
  0x16   :  { %142 = vmatpush1.bf16.msra.mxu0 %v420_v10 }
  0x17   :  { %143 = vmatprep.subr.bf16.mxu0 %v438_v0 }
  0x18   :  { %405 = vmatpush3.bf16.msra.mxu1 %v435_v19 }
  0x19   :  { %406 = vmatprep.subr.bf16.mxu1 %v436_v20 }
  0x1a   :  { %144 = vmatpush1.bf16.msra.mxu0 %v421_v12 }
  0x1b   :  { %145 = vmatprep.subr.bf16.mxu0 %v438_v0 }
  0x1c   :  { %407 = vmatpush3.bf16.msra.mxu1 %v436_v20 }
  0x1d   :  { %408 = vmatprep.subr.bf16.mxu1 %v437_v21 }
  0x1e   :  { %146 = vmatpush1.bf16.msra.mxu0 %v422_v13 }
  0x1f   :  { %161 = vmatprep.subr.bf16.mxu0 %v438_v0 }
  0x20   :  { %409 = vmatpush3.bf16.msra.mxu1 %v437_v21 }
  0x22   :  { %162 = vmatpush2.bf16.msra.mxu0 %v423_v14 }
  0x25   :  { %164 = vmatmul.mubr.bf16.vlgmr.msra.gmra.mxu0 %v424_v15 }
  0x26   :  { %355 = vmatprep.mubr.msk.bf16.mxu0 %vm124_vm0, %v427_v16 }
  0x2d   :  { %172 = vmatmul.mubr.bf16.gmra.mxu0 %v429_v17 }
  0xe5   :  { %v165_v23 = vpop.f32.mrf.mxu0 }
  0xe6   :  { %v166_v25 = vadd.f32 %v340_v22, %v165_v23 }
  0xe7   :  { %v167_v24 = vpop.f32.mrf.mxu0 }
  0xe8   :  { %v180_v29 = vmax.f32 %v166_v25, 0.0 }
  0xe9   :  { %v168_v26 = vpop.f32.mrf.mxu0 }
  0xea   :  { %v169_v27 = vadd.f32 %v340_v22, %v168_v26 }
  0xeb   :  { %v170_v28 = vpop.f32.mrf.mxu0 }
  0xec   :  { %v181_v30 = vmax.f32 %v169_v27, 0.0 }
  0xed   :  { %v173_v31 = vpop.f32.mrf.mxu0 }
  0xee   :  { %v184_v32 = vpack.c.bf16 %v181_v30, %v180_v29  ;;  %v174_v34 = vadd.f32 %v340_v22, %v173_v31 }
  0xef   :  { %v175_v33 = vpop.f32.mrf.mxu0 }
  0xf0   :  { %377 = vst [vmem:[%s567_s5] sm:$0xff] %v184_v32   ;;  %410 = vmatprep.mubr.bf16.mxu1 %v184_v32  ;;  %v182_v38 = vmax.f32 %v174_v34, 0.0 }
  0xf1   :  { %v176_v35 = vpop.f32.mrf.mxu0 }
  0xf2   :  { %v177_v36 = vadd.f32 %v340_v22, %v176_v35 }
  0xf3   :  { %v178_v37 = vpop.f32.mrf.mxu0 }
  0xf4   :  { %v183_v39 = vmax.f32 %v177_v36, 0.0 }
  0xf6   :  { %v185_v40 = vpack.c.bf16 %v183_v39, %v182_v38 }
  0xf8   :  { %383 = vst [vmem:[%s567_s5 + $0x8] sm:$0xff] %v185_v40   ;;  %411 = vmatmul.mubr.bf16.vlgmr.msra.gmra.mxu1 %v185_v40 }
 0x1b8   :  { %v412_v42 = vpop.f32.mrf.mxu1 }
 0x1b9   :  { %v318_v43 = vadd.f32 %v412_v42, %v360_v41 }
 0x1ba   :  { %v309_v44 = vpop.f32.mrf.mxu1 }
 0x1bb   :  { %v326_v45 = vmax.f32 %v318_v43, 0.0  ;;  %v310_v46 = vadd.f32 %v360_v41, %v309_v44 }
 0x1bc   :  { %v413_v47 = vpop.f32.mrf.mxu1 }
 0x1bd   :  { %330 = vst [vmem:[%s569_s6 + $0x10] sm:$0xff] %v326_v45  ;;  %v324_v48 = vmax.f32 %v310_v46, 0.0  ;;  %v321_v49 = vadd.f32 %v413_v47, %v360_v41 }
 0x1be   :  { %v312_v50 = vpop.f32.mrf.mxu1 }
 0x1bf   :  { %328 = vst [vmem:[%s569_s6] sm:$0xff] %v324_v48  ;;  %v327_v51 = vmax.f32 %v321_v49, 0.0  ;;  %v313_v52 = vadd.f32 %v360_v41, %v312_v50 }
 0x1c1   :  { %331 = vst [vmem:[%s569_s6 + $0x18] sm:$0xff] %v327_v51  ;;  %v325_v53 = vmax.f32 %v313_v52, 0.0 }
 0x1c3   :  { %329 = vst [vmem:[%s569_s6 + $0x8] sm:$0xff] %v325_v53 }

// kernel: fire_segmentation_forward.8
= control target key start
LH: loop header
LB: loop body
LE: loop exit
PB: predicated region body
PF: predicated region fallthrough
CT: control target
= control target key end

     0   :  { %v588_v2 = vmov 0.0   ;;  %vm589_vm0 = vmmov 0   ;;  %vm194_vm1 = vcmask 261120   ;;  %s744_s0 = inlined_call_operand.vmem [shape: bf16[16,288], index: 0, kind: input, shape index: {}]   ;;  %s745_s1 = inlined_call_operand.vmem [shape: bf16[288,128], index: 1, kind: input, shape index: {}]   ;;  %s746_s2 = inlined_call_operand.vmem [shape: f32[1,128], index: 2, kind: input, shape index: {}, may-alias: {2,4}]   ;;  %s747_s3 = inlined_call_operand.vmem [shape: bf16[128,128], index: 3, kind: input, shape index: {}]   ;;  %s748_s4 = inlined_call_operand.vmem [shape: f32[1,128], index: 4, kind: input, shape index: {}, may-alias: {2,4}]   ;;  %s749_s5 = inlined_call_operand.hbm [shape: bf16[16,128], index: 5, kind: output, shape index: {0}]   ;;  %s750_s6 = inlined_call_operand.vmem [shape: f32[16,128], index: 6, kind: output, shape index: {1}]  }
   0x1   :  { %v536_v0 = vld [vmem:[%s745_s1 + $0x78] sm:$0xff]   ;;  %503 = vmatprep.subr.bf16.mxu1 %v588_v2  ;;  %v538_v3 = vld [vmem:[%s745_s1 + $0x70] sm:$0xff]   ;;  %507 = vmatprep.mubr.msk.bf16.mxu1 %vm589_vm0, %v588_v2  ;;  %v540_v5 = vld [vmem:[%s745_s1 + $0x68] sm:$0xff]  }
   0x2   :  { %v537_v1 = vld [vmem:[%s745_s1 + $0x38] sm:$0xff]   ;;  %469 = vmatprep.subr.bf16.mxu0 %v536_v0  ;;  %v539_v4 = vld [vmem:[%s745_s1 + $0x30] sm:$0xff]   ;;  %v541_v6 = vld [vmem:[%s745_s1 + $0x28] sm:$0xff]  }
   0x3   :  { %470 = vmatpush3.bf16.msra.mxu0 %v537_v1  ;;  %v542_v7 = vld [vmem:[%s745_s1 + $0x60] sm:$0xff]   ;;  %v544_v9 = vld [vmem:[%s745_s1 + $0x58] sm:$0xff]   ;;  %v550_v10 = vld [vmem:[%s745_s1 + $0x88] sm:$0xff]  }
   0x4   :  { %471 = vmatprep.subr.bf16.mxu0 %v538_v3  ;;  %v543_v8 = vld [vmem:[%s745_s1 + $0x20] sm:$0xff]   ;;  %v545_v11 = vld [vmem:[%s745_s1 + $0x18] sm:$0xff]   ;;  %v546_v12 = vld [vmem:[%s745_s1 + $0x50] sm:$0xff]   ;;  %504 = vmatpush3.bf16.msra.mxu1 %v550_v10 }
   0x5   :  { %v547_v13 = vld [vmem:[%s745_s1 + $0x10] sm:$0xff]   ;;  %505 = vmatprep.subr.bf16.mxu1 %v588_v2  ;;  %v553_v14 = vld [vmem:[%s745_s1 + $0x80] sm:$0xff]   ;;  %v548_v15 = vld [vmem:[%s745_s1 + $0x48] sm:$0xff]  }
   0x6   :  { %v556_v16 = vld [vmem:[%s744_s0 + $0x4] ss:$12 sps:$4 sm:$0xff]   ;;  %v557_v17 = vld [vmem:[%s744_s0 + $0x8] ss:$12 sps:$4 sm:$0xff]   ;;  %v558_v18 = vld [vmem:[%s747_s3 + $0x38] sm:$0xff]  }
   0x7   :  { %472 = vmatpush3.bf16.msra.mxu0 %v539_v4  ;;  %230 = vmatprep.mubr.bf16.mxu0 %v556_v16  ;;  %v549_v19 = vld [vmem:[%s745_s1 + $0x8] sm:$0xff]   ;;  %v551_v20 = vld [vmem:[%s745_s1 + $0x40] sm:$0xff]   ;;  %v559_v21 = vld [vmem:[%s747_s3 + $0x30] sm:$0xff]  }
   0x8   :  { %473 = vmatprep.subr.bf16.mxu0 %v540_v5  ;;  %506 = vmatpush3.bf16.msra.mxu1 %v553_v14  ;;  %v552_v22 = vld [vmem:[%s745_s1] sm:$0xff]  }
   0x9   :  { %511 = vmatprep.subr.bf16.mxu1 %v588_v2 }
   0xb   :  { %474 = vmatpush3.bf16.msra.mxu0 %v541_v6  ;;  %508 = vmatmul.mubr.msk.bf16.vlgmr.msra.gmra.mxu1 %vm194_vm1, %v557_v17 }
   0xc   :  { %475 = vmatprep.subr.bf16.mxu0 %v542_v7  ;;  %512 = vmatpush3.bf16.msra.mxu1 %v558_v18 }
   0xd   :  { %513 = vmatprep.subr.bf16.mxu1 %v588_v2  ;;  %527 = vmatprep.mubr.msk.bf16.mxu1 %vm589_vm0, %v588_v2 }
   0xf   :  { %476 = vmatpush3.bf16.msra.mxu0 %v543_v8 }
  0x10   :  { %477 = vmatprep.subr.bf16.mxu0 %v544_v9 }
  0x13   :  { %478 = vmatpush3.bf16.msra.mxu0 %v545_v11 }
  0x14   :  { %479 = vmatprep.subr.bf16.mxu0 %v546_v12 }
  0x17   :  { %480 = vmatpush3.bf16.msra.mxu0 %v547_v13 }
  0x18   :  { %481 = vmatprep.subr.bf16.mxu0 %v548_v15 }
  0x1b   :  { %482 = vmatpush3.bf16.msra.mxu0 %v549_v19 }
  0x1c   :  { %12 = vsyncpa [#allocation3], 0  ;;  %483 = vmatprep.subr.bf16.mxu0 %v551_v20  ;;  %514 = vmatpush3.bf16.msra.mxu1 %v559_v21  ;;  %v560_v23 = vld [vmem:[%s747_s3 + $0x28] sm:$0xff]   ;;  %v561_v25 = vld [vmem:[%s747_s3 + $0x20] sm:$0xff]  }
  0x1d   :  { %515 = vmatprep.subr.bf16.mxu1 %v588_v2  ;;  %v554_v24 = vld [vmem:[%s744_s0] ss:$12 sps:$4 sm:$0xff]   ;;  %v562_v26 = vld [vmem:[%s747_s3 + $0x18] sm:$0xff]   ;;  %v563_v27 = vld [vmem:[%s747_s3 + $0x10] sm:$0xff]  }
  0x1e   :  { %v564_v28 = vld [vmem:[%s747_s3 + $0x8] sm:$0xff]   ;;  %v565_v29 = vld [vmem:[%s747_s3] sm:$0xff]   ;;  %s590_s3 = smov [#allocation2]  }
  0x1f   :  { %484 = vmatpush3.bf16.msra.mxu0 %v552_v22  ;;  %v428_v35 = vld [vmem:[%s746_s2] ss:$0 sm:$0xff]  ;;  %s413_s7 = sshll.u32 %s590_s3, 4  ;;  %s414_s7 = int_to_ptr.vmem [resolvable:$true] %s413_s7 }
  0x20   :  { %516 = vmatpush3.bf16.msra.mxu1 %v560_v23  ;;  %s566_s8 = scalar_lea.vmem %s414_s7, 128  ;;  %p571_p1 = scmp.lt.s32.totalorder %s414_s7, %s414_s7 }
  0x21   :  { %517 = vmatprep.subr.bf16.mxu1 %v588_v2  ;;  %p567_p0 = scmp.ne.s32.totalorder %s414_s7, %s566_s8  ;;  %p572_p2 = scmp.lt.s32.totalorder %s566_s8, %s566_s8 }
  0x22   :  { %231 = vmatmul.mubr.bf16.vlgmr.msra.gmra.mxu0 %v554_v24 }
  0x23   :  { %p573_p3 = por %p572_p2, %p571_p1 }
  0x24   :  { %518 = vmatpush3.bf16.msra.mxu1 %v561_v25 }
  0x25   :  { %519 = vmatprep.subr.bf16.mxu1 %v588_v2  ;;  %p574_p4 = pnand %p573_p3, %p567_p0 }
  0x28   :  { %520 = vmatpush3.bf16.msra.mxu1 %v562_v26 }
  0x29   :  { %521 = vmatprep.subr.bf16.mxu1 %v588_v2 }
  0x2c   :  { %522 = vmatpush3.bf16.msra.mxu1 %v563_v27 }
  0x2d   :  { %523 = vmatprep.subr.bf16.mxu1 %v588_v2 }
  0x30   :  { %524 = vmatpush3.bf16.msra.mxu1 %v564_v28 }
  0x31   :  { %525 = vmatprep.subr.bf16.mxu1 %v588_v2 }
  0x34   :  { %526 = vmatpush3.bf16.msra.mxu1 %v565_v29 }
  0xcb   :  { %v273_v30 = vpop.f32.mrf.mxu1 }
  0xcd   :  { %v509_v31 = vpop.f32.mrf.mxu1 }
  0xcf   :  { %v276_v32 = vpop.f32.mrf.mxu1 }
  0xd1   :  { %v510_v33 = vpop.f32.mrf.mxu1 }
  0xe2   :  { %v485_v34 = vpop.f32.mrf.mxu0 }
  0xe4   :  { %v486_v36 = vpop.f32.mrf.mxu0 }
  0xe5   :  { %v487_v37 = vadd.f32 %v486_v36, %v485_v34 }
  0xe6   :  { %v488_v38 = vpop.f32.mrf.mxu0 }
  0xe7   :  { %v233_v39 = vadd.f32 %v487_v37, %v428_v35 }
  0xe8   :  { %v489_v40 = vpop.f32.mrf.mxu0 }
  0xe9   :  { %v490_v41 = vadd.f32 %v489_v40, %v488_v38  ;;  %v274_v42 = vadd.f32 %v273_v30, %v233_v39 }
  0xeb   :  { %v236_v43 = vadd.f32 %v490_v41, %v428_v35  ;;  %v280_v45 = vmax.f32 %v274_v42, 0.0 }
  0xed   :  { %v277_v44 = vadd.f32 %v276_v32, %v236_v43 }
  0xef   :  { %v281_v46 = vmax.f32 %v277_v44, 0.0 }
  0xf1   :  { %v282_v47 = vpack.c.bf16 %v281_v46, %v280_v45 }
  0xf3   :  { %468 = vst [vmem:[#allocation2] sm:$0xff] %v282_v47   ;;  %528 = vmatmul.mubr.bf16.vlgmr.msra.gmra.mxu1 %v282_v47 }
  0xf4   :  { %577 = shalt.err (!%p574_p4)
}
  0xf5   :  { %s591_s2 = smov 64   ;;  %s592_s9 = smov 4   ;;  %v453_v48 = vld [vmem:[%s748_s4] ss:$0 sm:$0xff] }
  0xf6   :  { %419 = dma.vmem_to_hbm [thread:$0]  %s414_s7, 128, %s749_s5, [#allocation3], %s591_s2, %s591_s2, %s592_s9  }
 0x1b3   :  { %v397_v49 = vpop.f32.mrf.mxu1 }
 0x1b4   :  { %v398_v50 = vadd.f32 %v453_v48, %v397_v49 }
 0x1b5   :  { %v529_v51 = vpop.f32.mrf.mxu1 }
 0x1b6   :  { %v404_v52 = vmax.f32 %v398_v50, 0.0 }
 0x1b7   :  { %v400_v53 = vpop.f32.mrf.mxu1 }
 0x1b8   :  { %406 = vst [vmem:[%s750_s6] sm:$0xff] %v404_v52  ;;  %v401_v54 = vadd.f32 %v453_v48, %v400_v53 }
 0x1b9   :  { %v530_v55 = vpop.f32.mrf.mxu1 }
 0x1ba   :  { %v405_v56 = vmax.f32 %v401_v54, 0.0 }
 0x1bc   :  { %407 = vst [vmem:[%s750_s6 + $0x8] sm:$0xff] %v405_v56 }
 0x1bd   :  { %586 = dma.done.wait [#allocation3], 128  }
 0x1be   :  { %587 = vsyncadd [#allocation3], 4294967168 }
 0x1bf   :  { %427 = vsyncpa [#allocation3], 1 }

// kernel: fire_segmentation_forward.9
= control target key start
LH: loop header
LB: loop body
LE: loop exit
PB: predicated region body
PF: predicated region fallthrough
CT: control target
= control target key end

     0   :  { %s1723_s21 = smov 0   ;;  %s2187_s0 = inlined_call_operand.vmem [shape: bf16[2048,16], index: 0, kind: input, shape index: {}]   ;;  %s2188_s1 = inlined_call_operand.vmem [shape: bf16[2048,16], index: 1, kind: input, shape index: {}]   ;;  %s2189_s2 = inlined_call_operand.vmem [shape: bf16[2048,16], index: 2, kind: input, shape index: {}]   ;;  %s2190_s3 = inlined_call_operand.vmem [shape: bf16[2048,16], index: 3, kind: input, shape index: {}]   ;;  %s2191_s4 = inlined_call_operand.vmem [shape: bf16[16,128], index: 4, kind: input, shape index: {}]   ;;  %s2192_s5 = inlined_call_operand.vmem [shape: f32[1,128], index: 5, kind: input, shape index: {}]   ;;  %s2193_s6 = inlined_call_operand.vmem [shape: f32[2048,128], index: 6, kind: output, shape index: {}]  }
   0x1 LB: > { %s1487_s22 = sadd.s32 4294967295, %s1686_s21   ;;  %p1491_p0 = scmp.ge.s32.totalorder %s1686_s21, 1  ;;  %s1686_s21 = sphi %s1723_s21, %s16_s21  }
   0x2   : > { %p246_p1 = scmp.lt.s32.totalorder %s1686_s21, 5 }
   0x4   : > { %p247_p2 = pnand %p1491_p0, %p246_p1 }
   0x5   : > { %s1492_s25 = sshll.u32 (!%p247_p2), %s1487_s22, 6 }
   0x6   : > { %250 = sbr.rel (%p247_p2) target bundleno = 309 (0x135), region = 44  ;;  %p292_p3 = scmp.lt.s32.totalorder (!%p247_p2), %s1492_s25, 255 }
   0xb   : > { %v1679_v0 = vld [vmem:[%s2191_s4] sm:$0xff]   ;;  %s2195_s25 = smov (!%p292_p3, %s1492_s25), 255  ;;  %vm945_vm0 = vcmask 130048  }
   0xc   : > { %1603 = vmatprep.subr.bf16.mxu0 %v1679_v0  ;;  %1669 = vmatprep.subr.bf16.mxu1 %v1679_v0  ;;  %s1493_s26 = sshll.u32 %s2195_s25, 2  ;;  %s1501_s15 = sshll.u32 %s2195_s25, 3 }
   0xd   : > { %1604 = vmatpush3.bf16.msra.mxu0 %v1679_v0  ;;  %1670 = vmatpush3.bf16.msra.mxu1 %v1679_v0  ;;  %s1740_s29 = scalar_lea.vmem %s2187_s0, %s1493_s26  ;;  %s1745_s8 = scalar_lea.vmem %s2188_s1, %s1493_s26 }
   0xe   : > { %s1750_s11 = scalar_lea.vmem %s2189_s2, %s1493_s26  ;;  %s1755_s14 = scalar_lea.vmem %s2190_s3, %s1493_s26  ;;  %v322_v1 = vld [vmem:[%s1740_s29] sm:$0xf]  ;;  %v323_v2 = vld [vmem:[%s1740_s29 + $0x4] sm:$0xf]  ;;  %v324_v24 = vld [vmem:[%s1740_s29 + $0x8] sm:$0xf] }
   0xf   : > { %v386_v3 = vld [vmem:[%s1745_s8] sm:$0xf]  ;;  %v387_v4 = vld [vmem:[%s1745_s8 + $0x4] sm:$0xf]  ;;  %v325_v25 = vld [vmem:[%s1740_s29 + $0xc] sm:$0xf]  ;;  %s2054_s20 = scalar_lea.vmem %s2193_s6, %s1501_s15 }
  0x10   : > { %v450_v5 = vadd.bf16 %v386_v3, %v322_v1  ;;  %v514_v6 = vld [vmem:[%s1750_s11] sm:$0xf]  ;;  %v515_v7 = vld [vmem:[%s1750_s11 + $0x4] sm:$0xf]  ;;  %v451_v8 = vadd.bf16 %v387_v4, %v323_v2  ;;  %v388_v29 = vld [vmem:[%s1745_s8 + $0x8] sm:$0xf] }
  0x11   : > { %v642_v9 = vld [vmem:[%s1755_s14] sm:$0xf]  ;;  %v643_v10 = vld [vmem:[%s1755_s14 + $0x4] sm:$0xf]  ;;  %v389_v30 = vld [vmem:[%s1745_s8 + $0xc] sm:$0xf]  ;;  %v452_v32 = vadd.bf16 %v388_v29, %v324_v24 }
  0x12   : > { %v354_v11 = vld [vmem:[%s1740_s29 + $0x80] sm:$0xf]  ;;  %v578_v12 = vadd.bf16 %v514_v6, %v450_v5  ;;  %v355_v13 = vld [vmem:[%s1740_s29 + $0x84] sm:$0xf]  ;;  %v579_v16 = vadd.bf16 %v515_v7, %v451_v8  ;;  %v516_v31 = vld [vmem:[%s1750_s11 + $0x8] sm:$0xf]  ;;  %v453_v33 = vadd.bf16 %v389_v30, %v325_v25 }
  0x13   : > { %v418_v14 = vld [vmem:[%s1745_s8 + $0x80] sm:$0xf]  ;;  %v419_v15 = vld [vmem:[%s1745_s8 + $0x84] sm:$0xf]  ;;  %v517_v34 = vld [vmem:[%s1750_s11 + $0xc] sm:$0xf]  ;;  %v580_v43 = vadd.bf16 %v516_v31, %v452_v32 }
  0x14   : > { %v482_v17 = vadd.bf16 %v418_v14, %v354_v11  ;;  %v483_v18 = vadd.bf16 %v419_v15, %v355_v13  ;;  %v546_v19 = vld [vmem:[%s1750_s11 + $0x80] sm:$0xf]  ;;  %v547_v20 = vld [vmem:[%s1750_s11 + $0x84] sm:$0xf]  ;;  %v706_v22 = vadd.bf16 %v642_v9, %v578_v12  ;;  %v707_v26 = vadd.bf16 %v643_v10, %v579_v16  ;;  %v644_v35 = vld [vmem:[%s1755_s14 + $0x8] sm:$0xf] }
  0x15   : > { %v674_v21 = vld [vmem:[%s1755_s14 + $0x80] sm:$0xf]  ;;  %v675_v23 = vld [vmem:[%s1755_s14 + $0x84] sm:$0xf]  ;;  %v645_v36 = vld [vmem:[%s1755_s14 + $0xc] sm:$0xf]  ;;  %v581_v44 = vadd.bf16 %v517_v34, %v453_v33  ;;  %v708_v54 = vadd.bf16 %v644_v35, %v580_v43 }
  0x16   : > { %v610_v27 = vadd.bf16 %v546_v19, %v482_v17  ;;  %v611_v28 = vadd.bf16 %v547_v20, %v483_v18  ;;  %v1503_v37 = vcombine.low %v706_v22, %v707_v26  ;;  %v356_v40 = vld [vmem:[%s1740_s29 + $0x88] sm:$0xf]  ;;  %v357_v41 = vld [vmem:[%s1740_s29 + $0x8c] sm:$0xf]  ;;  %v326_v53 = vld [vmem:[%s1740_s29 + $0x10] sm:$0xf] }
  0x17   : > { %v420_v42 = vld [vmem:[%s1745_s8 + $0x88] sm:$0xf]  ;;  %v421_v45 = vld [vmem:[%s1745_s8 + $0x8c] sm:$0xf]  ;;  %v709_v55 = vadd.bf16 %v645_v36, %v581_v44  ;;  %v327_v57 = vld [vmem:[%s1740_s29 + $0x14] sm:$0xf] }
  0x18   : > { %v738_v38 = vadd.bf16 %v674_v21, %v610_v27  ;;  %v739_v39 = vadd.bf16 %v675_v23, %v611_v28  ;;  %v484_v46 = vadd.bf16 %v420_v42, %v356_v40  ;;  %v548_v47 = vld [vmem:[%s1750_s11 + $0x88] sm:$0xf]  ;;  %v549_v48 = vld [vmem:[%s1750_s11 + $0x8c] sm:$0xf]  ;;  %1605 = vmatprep.mubr.msk.bf16.mxu0 %vm945_vm0, %v1503_v37  ;;  %v485_v50 = vadd.bf16 %v421_v45, %v357_v41  ;;  %v390_v58 = vld [vmem:[%s1745_s8 + $0x10] sm:$0xf] }
  0x19   : > { %v676_v51 = vld [vmem:[%s1755_s14 + $0x88] sm:$0xf]  ;;  %v677_v52 = vld [vmem:[%s1755_s14 + $0x8c] sm:$0xf]  ;;  %v391_v59 = vld [vmem:[%s1745_s8 + $0x14] sm:$0xf]  ;;  %v454_v61 = vadd.bf16 %v390_v58, %v326_v53  ;;  %v1504_v2 = vcombine.low %v708_v54, %v709_v55 }
  0x1a   : > { %v1519_v49 = vcombine.low %v738_v38, %v739_v39  ;;  %v612_v56 = vadd.bf16 %v548_v47, %v484_v46  ;;  %v613_v60 = vadd.bf16 %v549_v48, %v485_v50  ;;  %v455_v62 = vadd.bf16 %v391_v59, %v327_v57  ;;  %v518_v63 = vld [vmem:[%s1750_s11 + $0x10] sm:$0xf]  ;;  %v519_v0 = vld [vmem:[%s1750_s11 + $0x14] sm:$0xf]  ;;  %v328_v21 = vld [vmem:[%s1740_s29 + $0x18] sm:$0xf] }
  0x1b   : > { %v646_v1 = vld [vmem:[%s1755_s14 + $0x10] sm:$0xf]  ;;  %v647_v4 = vld [vmem:[%s1755_s14 + $0x14] sm:$0xf]  ;;  %v582_v8 = vadd.bf16 %v518_v63, %v454_v61  ;;  %1606 = vmatmul.mubr.msk.bf16.vlgmr.msra.gmra.mxu0 %vm945_vm0, %v1504_v2  ;;  %v329_v22 = vld [vmem:[%s1740_s29 + $0x1c] sm:$0xf] }
  0x1c   : > { %1637 = vmatprep.mubr.msk.bf16.mxu1 %vm945_vm0, %v1519_v49  ;;  %v740_v3 = vadd.bf16 %v676_v51, %v612_v56  ;;  %v358_v5 = vld [vmem:[%s1740_s29 + $0x90] sm:$0xf]  ;;  %v359_v6 = vld [vmem:[%s1740_s29 + $0x94] sm:$0xf]  ;;  %v741_v7 = vadd.bf16 %v677_v52, %v613_v60  ;;  %v583_v9 = vadd.bf16 %v519_v0, %v455_v62  ;;  %v392_v23 = vld [vmem:[%s1745_s8 + $0x18] sm:$0xf] }
  0x1d   : > { %v422_v10 = vld [vmem:[%s1745_s8 + $0x90] sm:$0xf]  ;;  %v423_v11 = vld [vmem:[%s1745_s8 + $0x94] sm:$0xf]  ;;  %v710_v19 = vadd.bf16 %v646_v1, %v582_v8  ;;  %v393_v26 = vld [vmem:[%s1745_s8 + $0x1c] sm:$0xf]  ;;  %v456_v27 = vadd.bf16 %v392_v23, %v328_v21 }
  0x1e   : > { %v550_v12 = vld [vmem:[%s1750_s11 + $0x90] sm:$0xf]  ;;  %v486_v13 = vadd.bf16 %v422_v10, %v358_v5  ;;  %v487_v14 = vadd.bf16 %v423_v11, %v359_v6  ;;  %v551_v15 = vld [vmem:[%s1750_s11 + $0x94] sm:$0xf]  ;;  %v1520_v18 = vcombine.low %v740_v3, %v741_v7  ;;  %v711_v20 = vadd.bf16 %v647_v4, %v583_v9  ;;  %v520_v28 = vld [vmem:[%s1750_s11 + $0x18] sm:$0xf] }
  0x1f   : > { %v678_v16 = vld [vmem:[%s1755_s14 + $0x90] sm:$0xf]  ;;  %v679_v17 = vld [vmem:[%s1755_s14 + $0x94] sm:$0xf]  ;;  %v521_v29 = vld [vmem:[%s1750_s11 + $0x1c] sm:$0xf]  ;;  %v457_v31 = vadd.bf16 %v393_v26, %v329_v22  ;;  %v584_v37 = vadd.bf16 %v520_v28, %v456_v27 }
  0x20   : > { %v614_v24 = vadd.bf16 %v550_v12, %v486_v13  ;;  %v615_v25 = vadd.bf16 %v551_v15, %v487_v14  ;;  %1638 = vmatmul.mubr.msk.bf16.vlgmr.msra.gmra.mxu1 %vm945_vm0, %v1520_v18  ;;  %v1505_v30 = vcombine.low %v710_v19, %v711_v20  ;;  %v648_v32 = vld [vmem:[%s1755_s14 + $0x18] sm:$0xf]  ;;  %v649_v33 = vld [vmem:[%s1755_s14 + $0x1c] sm:$0xf]  ;;  %v330_v50 = vld [vmem:[%s1740_s29 + $0x20] sm:$0xf] }
  0x21   : > { %v360_v34 = vld [vmem:[%s1740_s29 + $0x98] sm:$0xf]  ;;  %v361_v38 = vld [vmem:[%s1740_s29 + $0x9c] sm:$0xf]  ;;  %v585_v41 = vadd.bf16 %v521_v29, %v457_v31  ;;  %v712_v48 = vadd.bf16 %v648_v32, %v584_v37  ;;  %v331_v51 = vld [vmem:[%s1740_s29 + $0x24] sm:$0xf] }
  0x22   : > { %v742_v35 = vadd.bf16 %v678_v16, %v614_v24  ;;  %v743_v36 = vadd.bf16 %v679_v17, %v615_v25  ;;  %v424_v39 = vld [vmem:[%s1745_s8 + $0x98] sm:$0xf]  ;;  %v425_v40 = vld [vmem:[%s1745_s8 + $0x9c] sm:$0xf]  ;;  %1609 = vmatprep.mubr.msk.bf16.mxu0 %vm945_vm0, %v1505_v30  ;;  %v394_v55 = vld [vmem:[%s1745_s8 + $0x20] sm:$0xf] }
  0x23   : > { %v488_v42 = vadd.bf16 %v424_v39, %v360_v34  ;;  %v489_v43 = vadd.bf16 %v425_v40, %v361_v38  ;;  %v552_v44 = vld [vmem:[%s1750_s11 + $0x98] sm:$0xf]  ;;  %v553_v45 = vld [vmem:[%s1750_s11 + $0x9c] sm:$0xf]  ;;  %v713_v52 = vadd.bf16 %v649_v33, %v585_v41  ;;  %v395_v56 = vld [vmem:[%s1745_s8 + $0x24] sm:$0xf]  ;;  %v458_v58 = vadd.bf16 %v394_v55, %v330_v50 }
  0x24   : > { %v680_v46 = vld [vmem:[%s1755_s14 + $0x98] sm:$0xf]  ;;  %v1521_v47 = vcombine.low %v742_v35, %v743_v36  ;;  %v681_v49 = vld [vmem:[%s1755_s14 + $0x9c] sm:$0xf]  ;;  %v522_v57 = vld [vmem:[%s1750_s11 + $0x20] sm:$0xf]  ;;  %v459_v59 = vadd.bf16 %v395_v56, %v331_v51 }
  0x25   : > { %v616_v53 = vadd.bf16 %v552_v44, %v488_v42  ;;  %v617_v54 = vadd.bf16 %v553_v45, %v489_v43  ;;  %v523_v60 = vld [vmem:[%s1750_s11 + $0x24] sm:$0xf]  ;;  %v650_v61 = vld [vmem:[%s1755_s14 + $0x20] sm:$0xf]  ;;  %v1506_v63 = vcombine.low %v712_v48, %v713_v52  ;;  %v586_v5 = vadd.bf16 %v522_v57, %v458_v58  ;;  %v332_v15 = vld [vmem:[%s1740_s29 + $0x28] sm:$0xf] }
  0x26   : > { %1641 = vmatprep.mubr.msk.bf16.mxu1 %vm945_vm0, %v1521_v47  ;;  %v651_v62 = vld [vmem:[%s1755_s14 + $0x24] sm:$0xf]  ;;  %v362_v2 = vld [vmem:[%s1740_s29 + $0xa0] sm:$0xf]  ;;  %v587_v6 = vadd.bf16 %v523_v60, %v459_v59  ;;  %v333_v19 = vld [vmem:[%s1740_s29 + $0x2c] sm:$0xf] }
  0x27   : > { %v744_v0 = vadd.bf16 %v680_v46, %v616_v53  ;;  %v745_v1 = vadd.bf16 %v681_v49, %v617_v54  ;;  %v363_v3 = vld [vmem:[%s1740_s29 + $0xa4] sm:$0xf]  ;;  %v426_v4 = vld [vmem:[%s1745_s8 + $0xa0] sm:$0xf]  ;;  %1610 = vmatmul.mubr.msk.bf16.gmra.mxu0 %vm945_vm0, %v1506_v63  ;;  %v714_v16 = vadd.bf16 %v650_v61, %v586_v5  ;;  %v396_v20 = vld [vmem:[%s1745_s8 + $0x28] sm:$0xf] }
  0x28   : > { %v427_v7 = vld [vmem:[%s1745_s8 + $0xa4] sm:$0xf]  ;;  %v490_v8 = vadd.bf16 %v426_v4, %v362_v2  ;;  %v554_v9 = vld [vmem:[%s1750_s11 + $0xa0] sm:$0xf]  ;;  %v715_v17 = vadd.bf16 %v651_v62, %v587_v6  ;;  %v397_v21 = vld [vmem:[%s1745_s8 + $0x2c] sm:$0xf]  ;;  %v460_v23 = vadd.bf16 %v396_v20, %v332_v15 }
  0x29   : > { %v555_v10 = vld [vmem:[%s1750_s11 + $0xa4] sm:$0xf]  ;;  %v1522_v11 = vcombine.low %v744_v0, %v745_v1  ;;  %v491_v12 = vadd.bf16 %v427_v7, %v363_v3  ;;  %v682_v13 = vld [vmem:[%s1755_s14 + $0xa0] sm:$0xf]  ;;  %v461_v24 = vadd.bf16 %v397_v21, %v333_v19  ;;  %v524_v25 = vld [vmem:[%s1750_s11 + $0x28] sm:$0xf] }
  0x2a   : > { %v683_v14 = vld [vmem:[%s1755_s14 + $0xa4] sm:$0xf]  ;;  %v618_v18 = vadd.bf16 %v554_v9, %v490_v8  ;;  %v525_v26 = vld [vmem:[%s1750_s11 + $0x2c] sm:$0xf]  ;;  %v652_v27 = vld [vmem:[%s1755_s14 + $0x28] sm:$0xf]  ;;  %v1507_v28 = vcombine.low %v714_v16, %v715_v17  ;;  %v588_v34 = vadd.bf16 %v524_v25, %v460_v23 }
  0x2b   : > { %1642 = vmatmul.mubr.msk.bf16.gmra.mxu1 %vm945_vm0, %v1522_v11  ;;  %v619_v22 = vadd.bf16 %v555_v10, %v491_v12  ;;  %v653_v30 = vld [vmem:[%s1755_s14 + $0x2c] sm:$0xf]  ;;  %v364_v31 = vld [vmem:[%s1740_s29 + $0xa8] sm:$0xf]  ;;  %v589_v35 = vadd.bf16 %v525_v26, %v461_v24  ;;  %v334_v47 = vld [vmem:[%s1740_s29 + $0x30] sm:$0xf] }
  0x2c   : > { %v746_v29 = vadd.bf16 %v682_v13, %v618_v18  ;;  %v365_v32 = vld [vmem:[%s1740_s29 + $0xac] sm:$0xf]  ;;  %v428_v36 = vld [vmem:[%s1745_s8 + $0xa8] sm:$0xf]  ;;  %1613 = vmatprep.mubr.msk.bf16.mxu0 %vm945_vm0, %v1507_v28  ;;  %v716_v45 = vadd.bf16 %v652_v27, %v588_v34  ;;  %v335_v48 = vld [vmem:[%s1740_s29 + $0x34] sm:$0xf] }
  0x2d   : > { %v747_v33 = vadd.bf16 %v683_v14, %v619_v22  ;;  %v429_v37 = vld [vmem:[%s1745_s8 + $0xac] sm:$0xf]  ;;  %v556_v38 = vld [vmem:[%s1750_s11 + $0xa8] sm:$0xf]  ;;  %v492_v39 = vadd.bf16 %v428_v36, %v364_v31  ;;  %v717_v46 = vadd.bf16 %v653_v30, %v589_v35  ;;  %v398_v49 = vld [vmem:[%s1745_s8 + $0x30] sm:$0xf] }
  0x2e   : > { %v493_v40 = vadd.bf16 %v429_v37, %v365_v32  ;;  %v557_v41 = vld [vmem:[%s1750_s11 + $0xac] sm:$0xf]  ;;  %v684_v42 = vld [vmem:[%s1755_s14 + $0xa8] sm:$0xf]  ;;  %v399_v52 = vld [vmem:[%s1745_s8 + $0x34] sm:$0xf]  ;;  %v462_v53 = vadd.bf16 %v398_v49, %v334_v47 }
  0x2f   : > { %v685_v43 = vld [vmem:[%s1755_s14 + $0xac] sm:$0xf]  ;;  %v1523_v44 = vcombine.low %v746_v29, %v747_v33  ;;  %v620_v50 = vadd.bf16 %v556_v38, %v492_v39  ;;  %v526_v54 = vld [vmem:[%s1750_s11 + $0x30] sm:$0xf]  ;;  %v527_v55 = vld [vmem:[%s1750_s11 + $0x34] sm:$0xf]  ;;  %v1508_v56 = vcombine.low %v716_v45, %v717_v46  ;;  %v463_v57 = vadd.bf16 %v399_v52, %v335_v48 }
  0x30   : > { %v621_v51 = vadd.bf16 %v557_v41, %v493_v40  ;;  %v654_v58 = vld [vmem:[%s1755_s14 + $0x30] sm:$0xf]  ;;  %v655_v59 = vld [vmem:[%s1755_s14 + $0x34] sm:$0xf]  ;;  %v590_v63 = vadd.bf16 %v526_v54, %v462_v53  ;;  %v336_v12 = vld [vmem:[%s1740_s29 + $0x38] sm:$0xf] }
  0x31   : > { %1645 = vmatprep.mubr.msk.bf16.mxu1 %vm945_vm0, %v1523_v44  ;;  %v366_v60 = vld [vmem:[%s1740_s29 + $0xb0] sm:$0xf]  ;;  %v748_v61 = vadd.bf16 %v684_v42, %v620_v50  ;;  %v367_v0 = vld [vmem:[%s1740_s29 + $0xb4] sm:$0xf]  ;;  %1614 = vmatmul.mubr.msk.bf16.gmra.mxu0 %vm945_vm0, %v1508_v56  ;;  %v591_v3 = vadd.bf16 %v527_v55, %v463_v57  ;;  %v337_v13 = vld [vmem:[%s1740_s29 + $0x3c] sm:$0xf] }
  0x32   : > { %v749_v62 = vadd.bf16 %v685_v43, %v621_v51  ;;  %v430_v1 = vld [vmem:[%s1745_s8 + $0xb0] sm:$0xf]  ;;  %v431_v2 = vld [vmem:[%s1745_s8 + $0xb4] sm:$0xf]  ;;  %v718_v10 = vadd.bf16 %v654_v58, %v590_v63  ;;  %v400_v17 = vld [vmem:[%s1745_s8 + $0x38] sm:$0xf] }
  0x33   : > { %v494_v4 = vadd.bf16 %v430_v1, %v366_v60  ;;  %v495_v5 = vadd.bf16 %v431_v2, %v367_v0  ;;  %v558_v6 = vld [vmem:[%s1750_s11 + $0xb0] sm:$0xf]  ;;  %v559_v7 = vld [vmem:[%s1750_s11 + $0xb4] sm:$0xf]  ;;  %v719_v14 = vadd.bf16 %v655_v59, %v591_v3  ;;  %v401_v18 = vld [vmem:[%s1745_s8 + $0x3c] sm:$0xf]  ;;  %v464_v20 = vadd.bf16 %v400_v17, %v336_v12 }
  0x34   : > { %v686_v8 = vld [vmem:[%s1755_s14 + $0xb0] sm:$0xf]  ;;  %v1524_v9 = vcombine.low %v748_v61, %v749_v62  ;;  %v687_v11 = vld [vmem:[%s1755_s14 + $0xb4] sm:$0xf]  ;;  %v528_v19 = vld [vmem:[%s1750_s11 + $0x38] sm:$0xf]  ;;  %v465_v21 = vadd.bf16 %v401_v18, %v337_v13 }
  0x35   : > { %v622_v15 = vadd.bf16 %v558_v6, %v494_v4  ;;  %v623_v16 = vadd.bf16 %v559_v7, %v495_v5  ;;  %v529_v22 = vld [vmem:[%s1750_s11 + $0x3c] sm:$0xf]  ;;  %v656_v23 = vld [vmem:[%s1755_s14 + $0x38] sm:$0xf]  ;;  %v1509_v25 = vcombine.low %v718_v10, %v719_v14  ;;  %v592_v31 = vadd.bf16 %v528_v19, %v464_v20  ;;  %v338_v41 = vld [vmem:[%s1740_s29 + $0x40] sm:$0xf] }
  0x36   : > { %1646 = vmatmul.mubr.msk.bf16.gmra.mxu1 %vm945_vm0, %v1524_v9  ;;  %v657_v24 = vld [vmem:[%s1755_s14 + $0x3c] sm:$0xf]  ;;  %v368_v28 = vld [vmem:[%s1740_s29 + $0xb8] sm:$0xf]  ;;  %v593_v32 = vadd.bf16 %v529_v22, %v465_v21  ;;  %v339_v45 = vld [vmem:[%s1740_s29 + $0x44] sm:$0xf] }
  0x37   : > { %v750_v26 = vadd.bf16 %v686_v8, %v622_v15  ;;  %v751_v27 = vadd.bf16 %v687_v11, %v623_v16  ;;  %v369_v29 = vld [vmem:[%s1740_s29 + $0xbc] sm:$0xf]  ;;  %v432_v30 = vld [vmem:[%s1745_s8 + $0xb8] sm:$0xf]  ;;  %1617 = vmatprep.mubr.msk.bf16.mxu0 %vm945_vm0, %v1509_v25  ;;  %v720_v42 = vadd.bf16 %v656_v23, %v592_v31  ;;  %v402_v46 = vld [vmem:[%s1745_s8 + $0x40] sm:$0xf] }
  0x38   : > { %v433_v33 = vld [vmem:[%s1745_s8 + $0xbc] sm:$0xf]  ;;  %v496_v34 = vadd.bf16 %v432_v30, %v368_v28  ;;  %v560_v35 = vld [vmem:[%s1750_s11 + $0xb8] sm:$0xf]  ;;  %v721_v43 = vadd.bf16 %v657_v24, %v593_v32  ;;  %v403_v47 = vld [vmem:[%s1745_s8 + $0x44] sm:$0xf]  ;;  %v466_v49 = vadd.bf16 %v402_v46, %v338_v41 }
  0x39   : > { %v561_v36 = vld [vmem:[%s1750_s11 + $0xbc] sm:$0xf]  ;;  %v1525_v37 = vcombine.low %v750_v26, %v751_v27  ;;  %v497_v38 = vadd.bf16 %v433_v33, %v369_v29  ;;  %v688_v39 = vld [vmem:[%s1755_s14 + $0xb8] sm:$0xf]  ;;  %v467_v50 = vadd.bf16 %v403_v47, %v339_v45  ;;  %v530_v51 = vld [vmem:[%s1750_s11 + $0x40] sm:$0xf] }
  0x3a   : > { %v689_v40 = vld [vmem:[%s1755_s14 + $0xbc] sm:$0xf]  ;;  %v624_v44 = vadd.bf16 %v560_v35, %v496_v34  ;;  %v531_v52 = vld [vmem:[%s1750_s11 + $0x44] sm:$0xf]  ;;  %v658_v53 = vld [vmem:[%s1755_s14 + $0x40] sm:$0xf]  ;;  %v1510_v54 = vcombine.low %v720_v42, %v721_v43  ;;  %v594_v60 = vadd.bf16 %v530_v51, %v466_v49 }
  0x3b   : > { %1649 = vmatprep.mubr.msk.bf16.mxu1 %vm945_vm0, %v1525_v37  ;;  %v625_v48 = vadd.bf16 %v561_v36, %v497_v38  ;;  %v659_v56 = vld [vmem:[%s1755_s14 + $0x44] sm:$0xf]  ;;  %v370_v57 = vld [vmem:[%s1740_s29 + $0xc0] sm:$0xf]  ;;  %v595_v61 = vadd.bf16 %v531_v52, %v467_v50  ;;  %v340_v9 = vld [vmem:[%s1740_s29 + $0x48] sm:$0xf] }
  0x3c   : > { %v752_v55 = vadd.bf16 %v688_v39, %v624_v44  ;;  %v371_v58 = vld [vmem:[%s1740_s29 + $0xc4] sm:$0xf]  ;;  %v434_v62 = vld [vmem:[%s1745_s8 + $0xc0] sm:$0xf]  ;;  %1618 = vmatmul.mubr.msk.bf16.gmra.mxu0 %vm945_vm0, %v1510_v54  ;;  %v722_v7 = vadd.bf16 %v658_v53, %v594_v60  ;;  %v341_v10 = vld [vmem:[%s1740_s29 + $0x4c] sm:$0xf] }
  0x3d   : > { %v753_v59 = vadd.bf16 %v689_v40, %v625_v48  ;;  %v435_v63 = vld [vmem:[%s1745_s8 + $0xc4] sm:$0xf]  ;;  %v562_v0 = vld [vmem:[%s1750_s11 + $0xc0] sm:$0xf]  ;;  %v498_v1 = vadd.bf16 %v434_v62, %v370_v57  ;;  %v723_v8 = vadd.bf16 %v659_v56, %v595_v61  ;;  %v404_v11 = vld [vmem:[%s1745_s8 + $0x48] sm:$0xf] }
  0x3e   : > { %v499_v2 = vadd.bf16 %v435_v63, %v371_v58  ;;  %v563_v3 = vld [vmem:[%s1750_s11 + $0xc4] sm:$0xf]  ;;  %v690_v4 = vld [vmem:[%s1755_s14 + $0xc0] sm:$0xf]  ;;  %v405_v14 = vld [vmem:[%s1745_s8 + $0x4c] sm:$0xf]  ;;  %v468_v15 = vadd.bf16 %v404_v11, %v340_v9 }
  0x3f   : > { %v691_v5 = vld [vmem:[%s1755_s14 + $0xc4] sm:$0xf]  ;;  %v1526_v6 = vcombine.low %v752_v55, %v753_v59  ;;  %v626_v12 = vadd.bf16 %v562_v0, %v498_v1  ;;  %v532_v16 = vld [vmem:[%s1750_s11 + $0x48] sm:$0xf]  ;;  %v533_v17 = vld [vmem:[%s1750_s11 + $0x4c] sm:$0xf]  ;;  %v1511_v18 = vcombine.low %v722_v7, %v723_v8  ;;  %v469_v19 = vadd.bf16 %v405_v14, %v341_v10 }
  0x40   : > { %v627_v13 = vadd.bf16 %v563_v3, %v499_v2  ;;  %v660_v20 = vld [vmem:[%s1755_s14 + $0x48] sm:$0xf]  ;;  %v661_v21 = vld [vmem:[%s1755_s14 + $0x4c] sm:$0xf]  ;;  %v596_v25 = vadd.bf16 %v532_v16, %v468_v15  ;;  %v342_v38 = vld [vmem:[%s1740_s29 + $0x50] sm:$0xf] }
  0x41   : > { %1650 = vmatmul.mubr.msk.bf16.gmra.mxu1 %vm945_vm0, %v1526_v6  ;;  %v372_v22 = vld [vmem:[%s1740_s29 + $0xc8] sm:$0xf]  ;;  %v754_v23 = vadd.bf16 %v690_v4, %v626_v12  ;;  %v373_v26 = vld [vmem:[%s1740_s29 + $0xcc] sm:$0xf]  ;;  %1621 = vmatprep.mubr.msk.bf16.mxu0 %vm945_vm0, %v1511_v18  ;;  %v597_v29 = vadd.bf16 %v533_v17, %v469_v19  ;;  %v343_v39 = vld [vmem:[%s1740_s29 + $0x54] sm:$0xf] }
  0x42   : > { %v755_v24 = vadd.bf16 %v691_v5, %v627_v13  ;;  %v436_v27 = vld [vmem:[%s1745_s8 + $0xc8] sm:$0xf]  ;;  %v437_v28 = vld [vmem:[%s1745_s8 + $0xcc] sm:$0xf]  ;;  %v724_v36 = vadd.bf16 %v660_v20, %v596_v25  ;;  %v406_v43 = vld [vmem:[%s1745_s8 + $0x50] sm:$0xf] }
  0x43   : > { %v500_v30 = vadd.bf16 %v436_v27, %v372_v22  ;;  %v501_v31 = vadd.bf16 %v437_v28, %v373_v26  ;;  %v564_v32 = vld [vmem:[%s1750_s11 + $0xc8] sm:$0xf]  ;;  %v565_v33 = vld [vmem:[%s1750_s11 + $0xcc] sm:$0xf]  ;;  %v725_v40 = vadd.bf16 %v661_v21, %v597_v29  ;;  %v407_v44 = vld [vmem:[%s1745_s8 + $0x54] sm:$0xf]  ;;  %v470_v46 = vadd.bf16 %v406_v43, %v342_v38 }
  0x44   : > { %v692_v34 = vld [vmem:[%s1755_s14 + $0xc8] sm:$0xf]  ;;  %v1527_v35 = vcombine.low %v754_v23, %v755_v24  ;;  %v693_v37 = vld [vmem:[%s1755_s14 + $0xcc] sm:$0xf]  ;;  %v534_v45 = vld [vmem:[%s1750_s11 + $0x50] sm:$0xf]  ;;  %v471_v47 = vadd.bf16 %v407_v44, %v343_v39 }
  0x45   : > { %v628_v41 = vadd.bf16 %v564_v32, %v500_v30  ;;  %v629_v42 = vadd.bf16 %v565_v33, %v501_v31  ;;  %v535_v48 = vld [vmem:[%s1750_s11 + $0x54] sm:$0xf]  ;;  %v662_v49 = vld [vmem:[%s1755_s14 + $0x50] sm:$0xf]  ;;  %v1512_v51 = vcombine.low %v724_v36, %v725_v40  ;;  %v598_v57 = vadd.bf16 %v534_v45, %v470_v46  ;;  %v344_v3 = vld [vmem:[%s1740_s29 + $0x58] sm:$0xf] }
  0x46   : > { %1653 = vmatprep.mubr.msk.bf16.mxu1 %vm945_vm0, %v1527_v35  ;;  %v663_v50 = vld [vmem:[%s1755_s14 + $0x54] sm:$0xf]  ;;  %v374_v54 = vld [vmem:[%s1740_s29 + $0xd0] sm:$0xf]  ;;  %v599_v58 = vadd.bf16 %v535_v48, %v471_v47  ;;  %v345_v7 = vld [vmem:[%s1740_s29 + $0x5c] sm:$0xf] }
  0x47   : > { %v756_v52 = vadd.bf16 %v692_v34, %v628_v41  ;;  %v757_v53 = vadd.bf16 %v693_v37, %v629_v42  ;;  %v375_v55 = vld [vmem:[%s1740_s29 + $0xd4] sm:$0xf]  ;;  %v438_v56 = vld [vmem:[%s1745_s8 + $0xd0] sm:$0xf]  ;;  %1622 = vmatmul.mubr.msk.bf16.gmra.mxu0 %vm945_vm0, %v1512_v51  ;;  %v726_v4 = vadd.bf16 %v662_v49, %v598_v57  ;;  %v408_v8 = vld [vmem:[%s1745_s8 + $0x58] sm:$0xf] }
  0x48   : > { %v439_v59 = vld [vmem:[%s1745_s8 + $0xd4] sm:$0xf]  ;;  %v502_v60 = vadd.bf16 %v438_v56, %v374_v54  ;;  %v566_v61 = vld [vmem:[%s1750_s11 + $0xd0] sm:$0xf]  ;;  %v727_v5 = vadd.bf16 %v663_v50, %v599_v58  ;;  %v409_v9 = vld [vmem:[%s1745_s8 + $0x5c] sm:$0xf]  ;;  %v472_v11 = vadd.bf16 %v408_v8, %v344_v3 }
  0x49   : > { %v567_v62 = vld [vmem:[%s1750_s11 + $0xd4] sm:$0xf]  ;;  %v1528_v63 = vcombine.low %v756_v52, %v757_v53  ;;  %v503_v0 = vadd.bf16 %v439_v59, %v375_v55  ;;  %v694_v1 = vld [vmem:[%s1755_s14 + $0xd0] sm:$0xf]  ;;  %v473_v12 = vadd.bf16 %v409_v9, %v345_v7  ;;  %v536_v13 = vld [vmem:[%s1750_s11 + $0x58] sm:$0xf] }
  0x4a   : > { %v695_v2 = vld [vmem:[%s1755_s14 + $0xd4] sm:$0xf]  ;;  %v630_v6 = vadd.bf16 %v566_v61, %v502_v60  ;;  %v537_v14 = vld [vmem:[%s1750_s11 + $0x5c] sm:$0xf]  ;;  %v664_v15 = vld [vmem:[%s1755_s14 + $0x58] sm:$0xf]  ;;  %v1513_v16 = vcombine.low %v726_v4, %v727_v5  ;;  %v600_v22 = vadd.bf16 %v536_v13, %v472_v11 }
  0x4b   : > { %1654 = vmatmul.mubr.msk.bf16.gmra.mxu1 %vm945_vm0, %v1528_v63  ;;  %v631_v10 = vadd.bf16 %v567_v62, %v503_v0  ;;  %v665_v18 = vld [vmem:[%s1755_s14 + $0x5c] sm:$0xf]  ;;  %v376_v19 = vld [vmem:[%s1740_s29 + $0xd8] sm:$0xf]  ;;  %v601_v23 = vadd.bf16 %v537_v14, %v473_v12  ;;  %v346_v35 = vld [vmem:[%s1740_s29 + $0x60] sm:$0xf] }
  0x4c   : > { %v758_v17 = vadd.bf16 %v694_v1, %v630_v6  ;;  %v377_v20 = vld [vmem:[%s1740_s29 + $0xdc] sm:$0xf]  ;;  %v440_v24 = vld [vmem:[%s1745_s8 + $0xd8] sm:$0xf]  ;;  %1625 = vmatprep.mubr.msk.bf16.mxu0 %vm945_vm0, %v1513_v16  ;;  %v728_v33 = vadd.bf16 %v664_v15, %v600_v22  ;;  %v347_v36 = vld [vmem:[%s1740_s29 + $0x64] sm:$0xf] }
  0x4d   : > { %v759_v21 = vadd.bf16 %v695_v2, %v631_v10  ;;  %v441_v25 = vld [vmem:[%s1745_s8 + $0xdc] sm:$0xf]  ;;  %v568_v26 = vld [vmem:[%s1750_s11 + $0xd8] sm:$0xf]  ;;  %v504_v27 = vadd.bf16 %v440_v24, %v376_v19  ;;  %v729_v34 = vadd.bf16 %v665_v18, %v601_v23  ;;  %v410_v37 = vld [vmem:[%s1745_s8 + $0x60] sm:$0xf] }
  0x4e   : > { %v505_v28 = vadd.bf16 %v441_v25, %v377_v20  ;;  %v569_v29 = vld [vmem:[%s1750_s11 + $0xdc] sm:$0xf]  ;;  %v696_v30 = vld [vmem:[%s1755_s14 + $0xd8] sm:$0xf]  ;;  %v411_v40 = vld [vmem:[%s1745_s8 + $0x64] sm:$0xf]  ;;  %v474_v41 = vadd.bf16 %v410_v37, %v346_v35 }
  0x4f   : > { %v697_v31 = vld [vmem:[%s1755_s14 + $0xdc] sm:$0xf]  ;;  %v1529_v32 = vcombine.low %v758_v17, %v759_v21  ;;  %v632_v38 = vadd.bf16 %v568_v26, %v504_v27  ;;  %v538_v42 = vld [vmem:[%s1750_s11 + $0x60] sm:$0xf]  ;;  %v539_v43 = vld [vmem:[%s1750_s11 + $0x64] sm:$0xf]  ;;  %v1514_v44 = vcombine.low %v728_v33, %v729_v34  ;;  %v475_v45 = vadd.bf16 %v411_v40, %v347_v36 }
  0x50   : > { %v633_v39 = vadd.bf16 %v569_v29, %v505_v28  ;;  %v666_v46 = vld [vmem:[%s1755_s14 + $0x60] sm:$0xf]  ;;  %v667_v47 = vld [vmem:[%s1755_s14 + $0x64] sm:$0xf]  ;;  %v602_v51 = vadd.bf16 %v538_v42, %v474_v41  ;;  %v348_v0 = vld [vmem:[%s1740_s29 + $0x68] sm:$0xf] }
  0x51   : > { %1657 = vmatprep.mubr.msk.bf16.mxu1 %vm945_vm0, %v1529_v32  ;;  %v378_v48 = vld [vmem:[%s1740_s29 + $0xe0] sm:$0xf]  ;;  %v760_v49 = vadd.bf16 %v696_v30, %v632_v38  ;;  %v379_v52 = vld [vmem:[%s1740_s29 + $0xe4] sm:$0xf]  ;;  %1626 = vmatmul.mubr.msk.bf16.gmra.mxu0 %vm945_vm0, %v1514_v44  ;;  %v603_v55 = vadd.bf16 %v539_v43, %v475_v45  ;;  %v349_v1 = vld [vmem:[%s1740_s29 + $0x6c] sm:$0xf] }
  0x52   : > { %v761_v50 = vadd.bf16 %v697_v31, %v633_v39  ;;  %v442_v53 = vld [vmem:[%s1745_s8 + $0xe0] sm:$0xf]  ;;  %v443_v54 = vld [vmem:[%s1745_s8 + $0xe4] sm:$0xf]  ;;  %v730_v62 = vadd.bf16 %v666_v46, %v602_v51  ;;  %v412_v5 = vld [vmem:[%s1745_s8 + $0x68] sm:$0xf] }
  0x53   : > { %v506_v56 = vadd.bf16 %v442_v53, %v378_v48  ;;  %v507_v57 = vadd.bf16 %v443_v54, %v379_v52  ;;  %v570_v58 = vld [vmem:[%s1750_s11 + $0xe0] sm:$0xf]  ;;  %v571_v59 = vld [vmem:[%s1750_s11 + $0xe4] sm:$0xf]  ;;  %v731_v2 = vadd.bf16 %v667_v47, %v603_v55  ;;  %v413_v6 = vld [vmem:[%s1745_s8 + $0x6c] sm:$0xf]  ;;  %v476_v8 = vadd.bf16 %v412_v5, %v348_v0 }
  0x54   : > { %v698_v60 = vld [vmem:[%s1755_s14 + $0xe0] sm:$0xf]  ;;  %v1530_v61 = vcombine.low %v760_v49, %v761_v50  ;;  %v699_v63 = vld [vmem:[%s1755_s14 + $0xe4] sm:$0xf]  ;;  %v540_v7 = vld [vmem:[%s1750_s11 + $0x68] sm:$0xf]  ;;  %v477_v9 = vadd.bf16 %v413_v6, %v349_v1 }
  0x55   : > { %v634_v3 = vadd.bf16 %v570_v58, %v506_v56  ;;  %v635_v4 = vadd.bf16 %v571_v59, %v507_v57  ;;  %v541_v10 = vld [vmem:[%s1750_s11 + $0x6c] sm:$0xf]  ;;  %v668_v11 = vld [vmem:[%s1755_s14 + $0x68] sm:$0xf]  ;;  %v1515_v13 = vcombine.low %v730_v62, %v731_v2  ;;  %v604_v19 = vadd.bf16 %v540_v7, %v476_v8  ;;  %v350_v29 = vld [vmem:[%s1740_s29 + $0x70] sm:$0xf] }
  0x56   : > { %1658 = vmatmul.mubr.msk.bf16.gmra.mxu1 %vm945_vm0, %v1530_v61  ;;  %v669_v12 = vld [vmem:[%s1755_s14 + $0x6c] sm:$0xf]  ;;  %v380_v16 = vld [vmem:[%s1740_s29 + $0xe8] sm:$0xf]  ;;  %v605_v20 = vadd.bf16 %v541_v10, %v477_v9  ;;  %v351_v33 = vld [vmem:[%s1740_s29 + $0x74] sm:$0xf] }
  0x57   : > { %v762_v14 = vadd.bf16 %v698_v60, %v634_v3  ;;  %v763_v15 = vadd.bf16 %v699_v63, %v635_v4  ;;  %v381_v17 = vld [vmem:[%s1740_s29 + $0xec] sm:$0xf]  ;;  %v444_v18 = vld [vmem:[%s1745_s8 + $0xe8] sm:$0xf]  ;;  %1629 = vmatprep.mubr.msk.bf16.mxu0 %vm945_vm0, %v1515_v13  ;;  %v732_v30 = vadd.bf16 %v668_v11, %v604_v19  ;;  %v414_v34 = vld [vmem:[%s1745_s8 + $0x70] sm:$0xf] }
  0x58   : > { %v445_v21 = vld [vmem:[%s1745_s8 + $0xec] sm:$0xf]  ;;  %v508_v22 = vadd.bf16 %v444_v18, %v380_v16  ;;  %v572_v23 = vld [vmem:[%s1750_s11 + $0xe8] sm:$0xf]  ;;  %v733_v31 = vadd.bf16 %v669_v12, %v605_v20  ;;  %v415_v35 = vld [vmem:[%s1745_s8 + $0x74] sm:$0xf]  ;;  %v478_v37 = vadd.bf16 %v414_v34, %v350_v29 }
  0x59   : > { %v573_v24 = vld [vmem:[%s1750_s11 + $0xec] sm:$0xf]  ;;  %v1531_v25 = vcombine.low %v762_v14, %v763_v15  ;;  %v509_v26 = vadd.bf16 %v445_v21, %v381_v17  ;;  %v700_v27 = vld [vmem:[%s1755_s14 + $0xe8] sm:$0xf]  ;;  %v479_v38 = vadd.bf16 %v415_v35, %v351_v33  ;;  %v542_v39 = vld [vmem:[%s1750_s11 + $0x70] sm:$0xf] }
  0x5a   : > { %v701_v28 = vld [vmem:[%s1755_s14 + $0xec] sm:$0xf]  ;;  %v636_v32 = vadd.bf16 %v572_v23, %v508_v22  ;;  %v543_v40 = vld [vmem:[%s1750_s11 + $0x74] sm:$0xf]  ;;  %v670_v41 = vld [vmem:[%s1755_s14 + $0x70] sm:$0xf]  ;;  %v1516_v42 = vcombine.low %v732_v30, %v733_v31  ;;  %v606_v48 = vadd.bf16 %v542_v39, %v478_v37 }
  0x5b   : > { %1661 = vmatprep.mubr.msk.bf16.mxu1 %vm945_vm0, %v1531_v25  ;;  %v637_v36 = vadd.bf16 %v573_v24, %v509_v26  ;;  %v671_v44 = vld [vmem:[%s1755_s14 + $0x74] sm:$0xf]  ;;  %v382_v45 = vld [vmem:[%s1740_s29 + $0xf0] sm:$0xf]  ;;  %v607_v49 = vadd.bf16 %v543_v40, %v479_v38  ;;  %v352_v61 = vld [vmem:[%s1740_s29 + $0x78] sm:$0xf] }
  0x5c   : > { %v764_v43 = vadd.bf16 %v700_v27, %v636_v32  ;;  %v383_v46 = vld [vmem:[%s1740_s29 + $0xf4] sm:$0xf]  ;;  %v446_v50 = vld [vmem:[%s1745_s8 + $0xf0] sm:$0xf]  ;;  %1630 = vmatmul.mubr.msk.bf16.gmra.mxu0 %vm945_vm0, %v1516_v42  ;;  %v734_v59 = vadd.bf16 %v670_v41, %v606_v48  ;;  %v353_v62 = vld [vmem:[%s1740_s29 + $0x7c] sm:$0xf] }
  0x5d   : > { %v765_v47 = vadd.bf16 %v701_v28, %v637_v36  ;;  %v447_v51 = vld [vmem:[%s1745_s8 + $0xf4] sm:$0xf]  ;;  %v574_v52 = vld [vmem:[%s1750_s11 + $0xf0] sm:$0xf]  ;;  %v510_v53 = vadd.bf16 %v446_v50, %v382_v45  ;;  %v735_v60 = vadd.bf16 %v671_v44, %v607_v49  ;;  %v416_v63 = vld [vmem:[%s1745_s8 + $0x78] sm:$0xf] }
  0x5e   : > { %v511_v54 = vadd.bf16 %v447_v51, %v383_v46  ;;  %v575_v55 = vld [vmem:[%s1750_s11 + $0xf4] sm:$0xf]  ;;  %v702_v56 = vld [vmem:[%s1755_s14 + $0xf0] sm:$0xf]  ;;  %v417_v2 = vld [vmem:[%s1745_s8 + $0x7c] sm:$0xf]  ;;  %v480_v3 = vadd.bf16 %v416_v63, %v352_v61 }
  0x5f   : > { %v703_v57 = vld [vmem:[%s1755_s14 + $0xf4] sm:$0xf]  ;;  %v1532_v58 = vcombine.low %v764_v43, %v765_v47  ;;  %v638_v0 = vadd.bf16 %v574_v52, %v510_v53  ;;  %v544_v4 = vld [vmem:[%s1750_s11 + $0x78] sm:$0xf]  ;;  %v545_v5 = vld [vmem:[%s1750_s11 + $0x7c] sm:$0xf]  ;;  %v1517_v6 = vcombine.low %v734_v59, %v735_v60  ;;  %v481_v7 = vadd.bf16 %v417_v2, %v353_v62 }
  0x60   : > { %v639_v1 = vadd.bf16 %v575_v55, %v511_v54  ;;  %v672_v8 = vld [vmem:[%s1755_s14 + $0x78] sm:$0xf]  ;;  %v673_v9 = vld [vmem:[%s1755_s14 + $0x7c] sm:$0xf]  ;;  %v608_v13 = vadd.bf16 %v544_v4, %v480_v3  ;;  %v2049_v33 = vld [vmem:[%s2192_s5] ss:$0 sm:$0xff] }
  0x61   : > { %1662 = vmatmul.mubr.msk.bf16.gmra.mxu1 %vm945_vm0, %v1532_v58  ;;  %v384_v10 = vld [vmem:[%s1740_s29 + $0xf8] sm:$0xf]  ;;  %v766_v11 = vadd.bf16 %v702_v56, %v638_v0  ;;  %v385_v14 = vld [vmem:[%s1740_s29 + $0xfc] sm:$0xf]  ;;  %1633 = vmatprep.mubr.msk.bf16.mxu0 %vm945_vm0, %v1517_v6  ;;  %v609_v17 = vadd.bf16 %v545_v5, %v481_v7 }
  0x62   : > { %v767_v12 = vadd.bf16 %v703_v57, %v639_v1  ;;  %v448_v15 = vld [vmem:[%s1745_s8 + $0xf8] sm:$0xf]  ;;  %v449_v16 = vld [vmem:[%s1745_s8 + $0xfc] sm:$0xf]  ;;  %v736_v23 = vadd.bf16 %v672_v8, %v608_v13 }
  0x63   : > { %v512_v18 = vadd.bf16 %v448_v15, %v384_v10  ;;  %v513_v19 = vadd.bf16 %v449_v16, %v385_v14  ;;  %v576_v20 = vld [vmem:[%s1750_s11 + $0xf8] sm:$0xf]  ;;  %v577_v21 = vld [vmem:[%s1750_s11 + $0xfc] sm:$0xf]  ;;  %v737_v26 = vadd.bf16 %v673_v9, %v609_v17 }
  0x64   : > { %v1533_v22 = vcombine.low %v766_v11, %v767_v12  ;;  %v704_v24 = vld [vmem:[%s1755_s14 + $0xf8] sm:$0xf]  ;;  %v705_v25 = vld [vmem:[%s1755_s14 + $0xfc] sm:$0xf] }
  0x65   : > { %v640_v27 = vadd.bf16 %v576_v20, %v512_v18  ;;  %v641_v28 = vadd.bf16 %v577_v21, %v513_v19  ;;  %v1518_v29 = vcombine.low %v736_v23, %v737_v26 }
  0x66   : > { %1665 = vmatprep.mubr.msk.bf16.mxu1 %vm945_vm0, %v1533_v22 }
  0x67   : > { %v768_v30 = vadd.bf16 %v704_v24, %v640_v27  ;;  %v769_v31 = vadd.bf16 %v705_v25, %v641_v28  ;;  %1634 = vmatmul.mubr.msk.bf16.gmra.mxu0 %vm945_vm0, %v1518_v29 }
  0x69   : > { %v1534_v32 = vcombine.low %v768_v30, %v769_v31 }
  0x6b   : > { %1666 = vmatmul.mubr.msk.bf16.gmra.mxu1 %vm945_vm0, %v1534_v32 }
  0xdb   : > { %v1607_v34 = vpop.f32.mrf.mxu0 }
  0xdc   : > { %v1085_v35 = vadd.f32 %v1607_v34, %v2049_v33 }
  0xdd   : > { %v1076_v36 = vpop.f32.mrf.mxu0 }
  0xde   : > { %1333 = vst [vmem:[%s2054_s20 + $0x10] sm:$0xff] %v1085_v35  ;;  %v1077_v38 = vadd.f32 %v2049_v33, %v1076_v36 }
  0xdf   : > { %v1608_v40 = vpop.f32.mrf.mxu0 }
  0xe0   : > { %v1639_v37 = vpop.f32.mrf.mxu1  ;;  %1331 = vst [vmem:[%s2054_s20] sm:$0xff] %v1077_v38  ;;  %v1088_v42 = vadd.f32 %v1608_v40, %v2049_v33 }
  0xe1   : > { %v1213_v39 = vadd.f32 %v1639_v37, %v2049_v33  ;;  %v1079_v44 = vpop.f32.mrf.mxu0 }
  0xe2   : > { %v1204_v41 = vpop.f32.mrf.mxu1  ;;  %1334 = vst [vmem:[%s2054_s20 + $0x18] sm:$0xff] %v1088_v42  ;;  %v1080_v46 = vadd.f32 %v2049_v33, %v1079_v44 }
  0xe3   : > { %1365 = vst [vmem:[%s2054_s20 + $0x110] sm:$0xff] %v1213_v39  ;;  %v1205_v43 = vadd.f32 %v2049_v33, %v1204_v41 }
  0xe4   : > { %v1640_v45 = vpop.f32.mrf.mxu1  ;;  %1332 = vst [vmem:[%s2054_s20 + $0x8] sm:$0xff] %v1080_v46 }
  0xe5   : > { %1363 = vst [vmem:[%s2054_s20 + $0x100] sm:$0xff] %v1205_v43  ;;  %v1216_v47 = vadd.f32 %v1640_v45, %v2049_v33 }
  0xe6   : > { %v1207_v48 = vpop.f32.mrf.mxu1 }
  0xe7   : > { %1366 = vst [vmem:[%s2054_s20 + $0x118] sm:$0xff] %v1216_v47  ;;  %v1208_v49 = vadd.f32 %v2049_v33, %v1207_v48  ;;  %v1611_v50 = vpop.f32.mrf.mxu0 }
  0xe8   : > { %v1101_v51 = vadd.f32 %v1611_v50, %v2049_v33 }
  0xe9   : > { %1364 = vst [vmem:[%s2054_s20 + $0x108] sm:$0xff] %v1208_v49  ;;  %v1092_v53 = vpop.f32.mrf.mxu0 }
  0xea   : > { %1337 = vst [vmem:[%s2054_s20 + $0x30] sm:$0xff] %v1101_v51  ;;  %v1093_v55 = vadd.f32 %v2049_v33, %v1092_v53 }
  0xeb   : > { %v1643_v52 = vpop.f32.mrf.mxu1  ;;  %v1612_v57 = vpop.f32.mrf.mxu0 }
  0xec   : > { %v1229_v54 = vadd.f32 %v1643_v52, %v2049_v33  ;;  %1335 = vst [vmem:[%s2054_s20 + $0x20] sm:$0xff] %v1093_v55  ;;  %v1104_v59 = vadd.f32 %v1612_v57, %v2049_v33 }
  0xed   : > { %v1220_v56 = vpop.f32.mrf.mxu1  ;;  %v1095_v61 = vpop.f32.mrf.mxu0 }
  0xee   : > { %1369 = vst [vmem:[%s2054_s20 + $0x130] sm:$0xff] %v1229_v54  ;;  %v1221_v58 = vadd.f32 %v2049_v33, %v1220_v56  ;;  %1338 = vst [vmem:[%s2054_s20 + $0x38] sm:$0xff] %v1104_v59  ;;  %v1096_v63 = vadd.f32 %v2049_v33, %v1095_v61 }
  0xef   : > { %v1644_v60 = vpop.f32.mrf.mxu1 }
  0xf0   : > { %1367 = vst [vmem:[%s2054_s20 + $0x120] sm:$0xff] %v1221_v58  ;;  %v1232_v62 = vadd.f32 %v1644_v60, %v2049_v33  ;;  %1336 = vst [vmem:[%s2054_s20 + $0x28] sm:$0xff] %v1096_v63 }
  0xf1   : > { %v1223_v0 = vpop.f32.mrf.mxu1  ;;  %v1615_v2 = vpop.f32.mrf.mxu0 }
  0xf2   : > { %1370 = vst [vmem:[%s2054_s20 + $0x138] sm:$0xff] %v1232_v62  ;;  %v1224_v1 = vadd.f32 %v2049_v33, %v1223_v0  ;;  %v1117_v3 = vadd.f32 %v1615_v2, %v2049_v33 }
  0xf3   : > { %v1108_v4 = vpop.f32.mrf.mxu0 }
  0xf4   : > { %1368 = vst [vmem:[%s2054_s20 + $0x128] sm:$0xff] %v1224_v1  ;;  %1341 = vst [vmem:[%s2054_s20 + $0x50] sm:$0xff] %v1117_v3  ;;  %v1109_v6 = vadd.f32 %v2049_v33, %v1108_v4 }
  0xf5   : > { %v1616_v8 = vpop.f32.mrf.mxu0 }
  0xf6   : > { %v1647_v5 = vpop.f32.mrf.mxu1  ;;  %1339 = vst [vmem:[%s2054_s20 + $0x40] sm:$0xff] %v1109_v6  ;;  %v1120_v10 = vadd.f32 %v1616_v8, %v2049_v33 }
  0xf7   : > { %v1245_v7 = vadd.f32 %v1647_v5, %v2049_v33  ;;  %v1111_v12 = vpop.f32.mrf.mxu0 }
  0xf8   : > { %v1236_v9 = vpop.f32.mrf.mxu1  ;;  %1342 = vst [vmem:[%s2054_s20 + $0x58] sm:$0xff] %v1120_v10  ;;  %v1112_v14 = vadd.f32 %v2049_v33, %v1111_v12 }
  0xf9   : > { %1373 = vst [vmem:[%s2054_s20 + $0x150] sm:$0xff] %v1245_v7  ;;  %v1237_v11 = vadd.f32 %v2049_v33, %v1236_v9 }
  0xfa   : > { %v1648_v13 = vpop.f32.mrf.mxu1  ;;  %1340 = vst [vmem:[%s2054_s20 + $0x48] sm:$0xff] %v1112_v14 }
  0xfb   : > { %1371 = vst [vmem:[%s2054_s20 + $0x140] sm:$0xff] %v1237_v11  ;;  %v1248_v15 = vadd.f32 %v1648_v13, %v2049_v33 }
  0xfc   : > { %v1239_v16 = vpop.f32.mrf.mxu1  ;;  %v1619_v18 = vpop.f32.mrf.mxu0 }
  0xfd   : > { %1374 = vst [vmem:[%s2054_s20 + $0x158] sm:$0xff] %v1248_v15  ;;  %v1240_v17 = vadd.f32 %v2049_v33, %v1239_v16  ;;  %v1133_v19 = vadd.f32 %v1619_v18, %v2049_v33 }
  0xfe   : > { %v1124_v20 = vpop.f32.mrf.mxu0 }
  0xff   : > { %1372 = vst [vmem:[%s2054_s20 + $0x148] sm:$0xff] %v1240_v17  ;;  %1345 = vst [vmem:[%s2054_s20 + $0x70] sm:$0xff] %v1133_v19  ;;  %v1125_v22 = vadd.f32 %v2049_v33, %v1124_v20 }
 0x100   : > { %v1620_v24 = vpop.f32.mrf.mxu0 }
 0x101   : > { %v1651_v21 = vpop.f32.mrf.mxu1  ;;  %1343 = vst [vmem:[%s2054_s20 + $0x60] sm:$0xff] %v1125_v22  ;;  %v1136_v26 = vadd.f32 %v1620_v24, %v2049_v33 }
 0x102   : > { %v1261_v23 = vadd.f32 %v1651_v21, %v2049_v33  ;;  %v1127_v28 = vpop.f32.mrf.mxu0 }
 0x103   : > { %v1252_v25 = vpop.f32.mrf.mxu1  ;;  %1346 = vst [vmem:[%s2054_s20 + $0x78] sm:$0xff] %v1136_v26  ;;  %v1128_v30 = vadd.f32 %v2049_v33, %v1127_v28 }
 0x104   : > { %1377 = vst [vmem:[%s2054_s20 + $0x170] sm:$0xff] %v1261_v23  ;;  %v1253_v27 = vadd.f32 %v2049_v33, %v1252_v25 }
 0x105   : > { %v1652_v29 = vpop.f32.mrf.mxu1  ;;  %1344 = vst [vmem:[%s2054_s20 + $0x68] sm:$0xff] %v1128_v30 }
 0x106   : > { %1375 = vst [vmem:[%s2054_s20 + $0x160] sm:$0xff] %v1253_v27  ;;  %v1264_v31 = vadd.f32 %v1652_v29, %v2049_v33 }
 0x107   : > { %v1255_v32 = vpop.f32.mrf.mxu1  ;;  %v1623_v35 = vpop.f32.mrf.mxu0 }
 0x108   : > { %1378 = vst [vmem:[%s2054_s20 + $0x178] sm:$0xff] %v1264_v31  ;;  %v1256_v34 = vadd.f32 %v2049_v33, %v1255_v32  ;;  %v1149_v36 = vadd.f32 %v1623_v35, %v2049_v33 }
 0x109   : > { %v1140_v38 = vpop.f32.mrf.mxu0 }
 0x10a   : > { %1376 = vst [vmem:[%s2054_s20 + $0x168] sm:$0xff] %v1256_v34  ;;  %1349 = vst [vmem:[%s2054_s20 + $0x90] sm:$0xff] %v1149_v36  ;;  %v1141_v40 = vadd.f32 %v2049_v33, %v1140_v38 }
 0x10b   : > { %v1655_v37 = vpop.f32.mrf.mxu1  ;;  %v1624_v42 = vpop.f32.mrf.mxu0 }
 0x10c   : > { %v1277_v39 = vadd.f32 %v1655_v37, %v2049_v33  ;;  %1347 = vst [vmem:[%s2054_s20 + $0x80] sm:$0xff] %v1141_v40  ;;  %v1152_v44 = vadd.f32 %v1624_v42, %v2049_v33 }
 0x10d   : > { %v1268_v41 = vpop.f32.mrf.mxu1  ;;  %v1143_v46 = vpop.f32.mrf.mxu0 }
 0x10e   : > { %1381 = vst [vmem:[%s2054_s20 + $0x190] sm:$0xff] %v1277_v39  ;;  %v1269_v43 = vadd.f32 %v2049_v33, %v1268_v41  ;;  %1350 = vst [vmem:[%s2054_s20 + $0x98] sm:$0xff] %v1152_v44  ;;  %v1144_v48 = vadd.f32 %v2049_v33, %v1143_v46 }
 0x10f   : > { %v1656_v45 = vpop.f32.mrf.mxu1 }
 0x110   : > { %1379 = vst [vmem:[%s2054_s20 + $0x180] sm:$0xff] %v1269_v43  ;;  %v1280_v47 = vadd.f32 %v1656_v45, %v2049_v33  ;;  %1348 = vst [vmem:[%s2054_s20 + $0x88] sm:$0xff] %v1144_v48 }
 0x111   : > { %v1271_v49 = vpop.f32.mrf.mxu1  ;;  %v1627_v51 = vpop.f32.mrf.mxu0 }
 0x112   : > { %1382 = vst [vmem:[%s2054_s20 + $0x198] sm:$0xff] %v1280_v47  ;;  %v1272_v50 = vadd.f32 %v2049_v33, %v1271_v49  ;;  %v1165_v52 = vadd.f32 %v1627_v51, %v2049_v33 }
 0x113   : > { %v1156_v53 = vpop.f32.mrf.mxu0 }
 0x114   : > { %1380 = vst [vmem:[%s2054_s20 + $0x188] sm:$0xff] %v1272_v50  ;;  %1353 = vst [vmem:[%s2054_s20 + $0xb0] sm:$0xff] %v1165_v52  ;;  %v1157_v55 = vadd.f32 %v2049_v33, %v1156_v53 }
 0x115   : > { %v1628_v57 = vpop.f32.mrf.mxu0 }
 0x116   : > { %v1659_v54 = vpop.f32.mrf.mxu1  ;;  %1351 = vst [vmem:[%s2054_s20 + $0xa0] sm:$0xff] %v1157_v55  ;;  %v1168_v59 = vadd.f32 %v1628_v57, %v2049_v33 }
 0x117   : > { %v1293_v56 = vadd.f32 %v1659_v54, %v2049_v33  ;;  %v1159_v61 = vpop.f32.mrf.mxu0 }
 0x118   : > { %v1284_v58 = vpop.f32.mrf.mxu1  ;;  %1354 = vst [vmem:[%s2054_s20 + $0xb8] sm:$0xff] %v1168_v59  ;;  %v1160_v63 = vadd.f32 %v2049_v33, %v1159_v61 }
 0x119   : > { %1385 = vst [vmem:[%s2054_s20 + $0x1b0] sm:$0xff] %v1293_v56  ;;  %v1285_v60 = vadd.f32 %v2049_v33, %v1284_v58 }
 0x11a   : > { %v1660_v62 = vpop.f32.mrf.mxu1  ;;  %1352 = vst [vmem:[%s2054_s20 + $0xa8] sm:$0xff] %v1160_v63 }
 0x11b   : > { %1383 = vst [vmem:[%s2054_s20 + $0x1a0] sm:$0xff] %v1285_v60  ;;  %v1296_v0 = vadd.f32 %v1660_v62, %v2049_v33 }
 0x11c   : > { %v1287_v1 = vpop.f32.mrf.mxu1  ;;  %v1631_v3 = vpop.f32.mrf.mxu0 }
 0x11d   : > { %1386 = vst [vmem:[%s2054_s20 + $0x1b8] sm:$0xff] %v1296_v0  ;;  %v1288_v2 = vadd.f32 %v2049_v33, %v1287_v1  ;;  %v1181_v4 = vadd.f32 %v1631_v3, %v2049_v33 }
 0x11e   : > { %v1172_v5 = vpop.f32.mrf.mxu0 }
 0x11f   : > { %1384 = vst [vmem:[%s2054_s20 + $0x1a8] sm:$0xff] %v1288_v2  ;;  %1357 = vst [vmem:[%s2054_s20 + $0xd0] sm:$0xff] %v1181_v4  ;;  %v1173_v7 = vadd.f32 %v2049_v33, %v1172_v5 }
 0x120   : > { %v1632_v9 = vpop.f32.mrf.mxu0 }
 0x121   : > { %v1663_v6 = vpop.f32.mrf.mxu1  ;;  %1355 = vst [vmem:[%s2054_s20 + $0xc0] sm:$0xff] %v1173_v7  ;;  %v1184_v11 = vadd.f32 %v1632_v9, %v2049_v33 }
 0x122   : > { %v1309_v8 = vadd.f32 %v1663_v6, %v2049_v33  ;;  %v1175_v13 = vpop.f32.mrf.mxu0 }
 0x123   : > { %v1300_v10 = vpop.f32.mrf.mxu1  ;;  %1358 = vst [vmem:[%s2054_s20 + $0xd8] sm:$0xff] %v1184_v11  ;;  %v1176_v15 = vadd.f32 %v2049_v33, %v1175_v13 }
 0x124   : > { %1389 = vst [vmem:[%s2054_s20 + $0x1d0] sm:$0xff] %v1309_v8  ;;  %v1301_v12 = vadd.f32 %v2049_v33, %v1300_v10 }
 0x125   : > { %v1664_v14 = vpop.f32.mrf.mxu1  ;;  %1356 = vst [vmem:[%s2054_s20 + $0xc8] sm:$0xff] %v1176_v15 }
 0x126   : > { %1387 = vst [vmem:[%s2054_s20 + $0x1c0] sm:$0xff] %v1301_v12  ;;  %v1312_v16 = vadd.f32 %v1664_v14, %v2049_v33 }
 0x127   : > { %v1303_v17 = vpop.f32.mrf.mxu1  ;;  %v1635_v19 = vpop.f32.mrf.mxu0 }
 0x128   : > { %1390 = vst [vmem:[%s2054_s20 + $0x1d8] sm:$0xff] %v1312_v16  ;;  %v1304_v18 = vadd.f32 %v2049_v33, %v1303_v17  ;;  %v1197_v20 = vadd.f32 %v1635_v19, %v2049_v33 }
 0x129   : > { %v1188_v22 = vpop.f32.mrf.mxu0 }
 0x12a   : > { %1388 = vst [vmem:[%s2054_s20 + $0x1c8] sm:$0xff] %v1304_v18  ;;  %1361 = vst [vmem:[%s2054_s20 + $0xf0] sm:$0xff] %v1197_v20  ;;  %v1189_v24 = vadd.f32 %v2049_v33, %v1188_v22 }
 0x12b   : > { %v1667_v21 = vpop.f32.mrf.mxu1  ;;  %v1636_v26 = vpop.f32.mrf.mxu0 }
 0x12c   : > { %v1325_v23 = vadd.f32 %v1667_v21, %v2049_v33  ;;  %1359 = vst [vmem:[%s2054_s20 + $0xe0] sm:$0xff] %v1189_v24  ;;  %v1200_v28 = vadd.f32 %v1636_v26, %v2049_v33 }
 0x12d   : > { %v1316_v25 = vpop.f32.mrf.mxu1  ;;  %v1191_v30 = vpop.f32.mrf.mxu0 }
 0x12e   : > { %1393 = vst [vmem:[%s2054_s20 + $0x1f0] sm:$0xff] %v1325_v23  ;;  %v1317_v27 = vadd.f32 %v2049_v33, %v1316_v25  ;;  %1362 = vst [vmem:[%s2054_s20 + $0xf8] sm:$0xff] %v1200_v28  ;;  %v1192_v32 = vadd.f32 %v2049_v33, %v1191_v30 }
 0x12f   : > { %v1668_v29 = vpop.f32.mrf.mxu1 }
 0x130   : > { %1391 = vst [vmem:[%s2054_s20 + $0x1e0] sm:$0xff] %v1317_v27  ;;  %v1328_v31 = vadd.f32 %v1668_v29, %v2049_v33  ;;  %1360 = vst [vmem:[%s2054_s20 + $0xe8] sm:$0xff] %v1192_v32 }
 0x131   : > { %v1319_v34 = vpop.f32.mrf.mxu1 }
 0x132   : > { %1394 = vst [vmem:[%s2054_s20 + $0x1f8] sm:$0xff] %v1328_v31  ;;  %v1320_v35 = vadd.f32 %v2049_v33, %v1319_v34 }
 0x134   : > { %1392 = vst [vmem:[%s2054_s20 + $0x1e8] sm:$0xff] %v1320_v35 }
 0x135 PF: > { %s16_s21 = sadd.s32 1, %s1686_s21  }
 0x136   : > { %p13_p4 = scmp.ge.s32.totalorder %s16_s21, 6  }
 0x138   :  { %15 = sbr.rel (!%p13_p4) target bundleno = 1 (0x1), region = 83 }

</bundles_post_ra>
